<compile_context>
chip_gen: v5e
topology: v5e:2x2
jax: 0.10.0
libtpu: 0.0.40
codegen_flags: <defaults>
</compile_context>

<pallas_src>
import functools
import math

import numpy as np
import jax
import jax.numpy as jnp
from jax.experimental import pallas as pl
from jax.experimental.pallas import tpu as pltpu

# ----------------------------------------------------------------------------
# Config (scaled-down stand-in for the real model:
#   real: image size [322, 518], hidden 384, 12 layers, 6 heads, patch 14)
# ----------------------------------------------------------------------------
PATCH = 14
TARGET_H, TARGET_W = 28, 42            # stand-in for DEPTH_ANYTHING_IMAGE_SIZE
HIDDEN = 32
NUM_HEADS = 2
HEAD_DIM = HIDDEN // NUM_HEADS
NUM_LAYERS = 2
MLP_DIM = 4 * HIDDEN
PH, PW = TARGET_H // PATCH, TARGET_W // PATCH
NUM_PATCHES = PH * PW
SEQ = NUM_PATCHES + 1
LN_EPS = 1e-6

IMAGENET_MEAN = np.array([0.485, 0.456, 0.406], np.float32)
IMAGENET_STD = np.array([0.229, 0.224, 0.225], np.float32)


# ----------------------------------------------------------------------------
# Interpolation weight matrices (separable resize == two matmuls).
# ----------------------------------------------------------------------------
def _bicubic_matrix(out_size, in_size, a=-0.75):
    """PyTorch F.interpolate(mode='bicubic', align_corners=False) as a matrix."""
    def cc1(x):
        return ((a + 2.0) * x - (a + 3.0)) * x * x + 1.0

    def cc2(x):
        return ((a * x - 5.0 * a) * x + 8.0 * a) * x - 4.0 * a

    scale = in_size / out_size
    i = np.arange(out_size)
    x = (i + 0.5) * scale - 0.5
    x0 = np.floor(x).astype(np.int64)
    t = x - x0
    coeffs = np.stack([cc2(t + 1.0), cc1(t), cc1(1.0 - t), cc2(2.0 - t)], axis=-1)
    W = np.zeros((out_size, in_size), np.float32)
    for k in range(4):
        idx = np.clip(x0 + k - 1, 0, in_size - 1)
        np.add.at(W, (i, idx), coeffs[:, k])
    return jnp.asarray(W)


def _bilinear_matrix(out_size, in_size):
    """PyTorch bilinear (align_corners=False) resize as a matrix."""
    scale = in_size / out_size
    i = np.arange(out_size)
    x = np.maximum((i + 0.5) * scale - 0.5, 0.0)
    x0 = np.floor(x).astype(np.int64)
    t = x - x0
    W = np.zeros((out_size, in_size), np.float32)
    i0 = np.clip(x0, 0, in_size - 1)
    i1 = np.clip(x0 + 1, 0, in_size - 1)
    np.add.at(W, (i, i0), 1.0 - t)
    np.add.at(W, (i, i1), t)
    return jnp.asarray(W)


# ----------------------------------------------------------------------------
# Resize (+ folded normalization) kernel
# ----------------------------------------------------------------------------
def _resize_norm_kernel(x_ref, wh_ref, wwt_ref, scale_ref, bias_ref, o_ref,
                        *, rows_first):
    """out[n, c] = (Wh @ x[n, c] @ Ww^T) * scale[c] + bias[c]."""
    c = pl.program_id(1)
    x = x_ref[0, 0]                                      # (Hi, Wi)
    if rows_first:
        y = jnp.dot(jnp.dot(wh_ref[...], x, preferred_element_type=jnp.float32),
                    wwt_ref[...], preferred_element_type=jnp.float32)
    else:
        y = jnp.dot(wh_ref[...],
                    jnp.dot(x, wwt_ref[...], preferred_element_type=jnp.float32),
                    preferred_element_type=jnp.float32)
    o_ref[0, 0] = (y * scale_ref[c] + bias_ref[c]).astype(o_ref.dtype)


def resize_scale_bias(x, wh, wwt, scale, bias, out_dtype=jnp.float32):
    # TODO(synk): at real camera resolutions tile the output rows
    # (grid=(n, c, ho_tiles), ho tile a multiple of 8) and use bf16 resize
    # matrices with f32 accumulation; full blocks are fine at these toy sizes.
    n, c, hi, wi = x.shape
    ho = wh.shape[0]
    wo = wwt.shape[1]
    rows_first = (ho * hi * wi + ho * wi * wo) <= (hi * wi * wo + ho * hi * wo)
    return pl.pallas_call(
        functools.partial(_resize_norm_kernel, rows_first=rows_first),
        out_shape=jax.ShapeDtypeStruct((n, c, ho, wo), out_dtype),
        grid_spec=pltpu.PrefetchScalarGridSpec(
            num_scalar_prefetch=0,
            grid=(n, c),
            in_specs=[
                pl.BlockSpec((1, 1, hi, wi), lambda i, j: (i, j, 0, 0)),
                pl.BlockSpec((ho, hi), lambda i, j: (0, 0)),
                pl.BlockSpec((wi, wo), lambda i, j: (0, 0)),
                pl.BlockSpec(memory_space=pltpu.MemorySpace.SMEM),
                pl.BlockSpec(memory_space=pltpu.MemorySpace.SMEM),
            ],
            out_specs=pl.BlockSpec((1, 1, ho, wo), lambda i, j: (i, j, 0, 0)),
        ),
        compiler_params=pltpu.CompilerParams(
            dimension_semantics=("parallel", "parallel")),
    )(x, wh, wwt, scale, bias)


# ----------------------------------------------------------------------------
# Row-tiled dense (patch embedding)
# ----------------------------------------------------------------------------
def _dense_kernel(x_ref, w_ref, b_ref, o_ref):
    y = jnp.dot(x_ref[...].astype(jnp.bfloat16), w_ref[...],
                preferred_element_type=jnp.float32)
    o_ref[...] = y + b_ref[...]


def dense_rows(x, w_bf16, b, tile_m=256):
    """Row-tiled dense: bf16 operands, f32 accumulation, parallel row grid.

    Tail fix (review): grid = cdiv(m, tile) with a partial (masked) last block
    instead of degenerating to one giant block when m % tile != 0.
    """
    m, k = x.shape
    n_out = w_bf16.shape[1]
    tm = tile_m if m > tile_m else m
    return pl.pallas_call(
        _dense_kernel,
        out_shape=jax.ShapeDtypeStruct((m, n_out), jnp.float32),
        grid_spec=pltpu.PrefetchScalarGridSpec(
            num_scalar_prefetch=0,
            grid=(pl.cdiv(m, tm),),
            in_specs=[pl.BlockSpec((tm, k), lambda i: (i, 0)),
                      pl.BlockSpec((k, n_out), lambda i: (0, 0)),
                      pl.BlockSpec((1, n_out), lambda i: (0, 0))],
            out_specs=pl.BlockSpec((tm, n_out), lambda i: (i, 0)),
        ),
        compiler_params=pltpu.CompilerParams(dimension_semantics=("parallel",)),
    )(x, w_bf16, b)


# ----------------------------------------------------------------------------
# Fused ViT encoder:  grid = (batch, layer)
#   h is carried in a VMEM scratch across the layer axis (no HBM round trips);
#   per-layer weights are streamed via BlockSpec (prefetch of layer l+1);
#   feature pooling / cls-attention / per-patch depth are emitted at the last
#   layer only (h never written back to HBM at all).
# ----------------------------------------------------------------------------
def _vit_encoder_kernel(h0_ref, ln1g_ref, ln1b_ref, qkvw_ref, qkvb_ref,
                        projw_ref, projb_ref, ln2g_ref, ln2b_ref,
                        fc1w_ref, fc1b_ref, fc2w_ref, fc2b_ref,
                        dw_ref, db_ref,
                        feat_ref, attnmap_ref, depth_ref,
                        h_sc, attn_sc,
                        *, num_heads, head_dim, scale):
    l = pl.program_id(1)
    n_layers = pl.num_programs(1)
    d_model = num_heads * head_dim
    inv_d = 1.0 / d_model

    # ---- layer 0: load the embedding into the VMEM-resident carry ----
    @pl.when(l == 0)
    def _():
        h_sc[...] = h0_ref[0]

    x = h_sc[...]                                        # (S, D) f32, carried
    s_len = x.shape[0]

    # ---- LayerNorm 1 (single pass: sum & sum-of-squares) ----
    m1 = jnp.sum(x, axis=-1, keepdims=True) * inv_d
    q1 = jnp.sum(x * x, axis=-1, keepdims=True) * inv_d
    xn = (x - m1) * jax.lax.rsqrt(q1 - m1 * m1 + LN_EPS) * ln1g_ref[0] + ln1b_ref[0]

    # ---- fused QKV projection (bf16 operands, f32 MXU accumulation) ----
    qkv = jnp.dot(xn.astype(jnp.bfloat16), qkvw_ref[0],
                  preferred_element_type=jnp.float32) + qkvb_ref[0]

    # ---- batched per-head attention: (H, S, hd) tensors, 3-D einsums ----
    def split_heads(t):
        return jnp.stack(
            [t[:, i * head_dim:(i + 1) * head_dim] for i in range(num_heads)],
            axis=0)

    qh = split_heads(qkv[:, :d_model]).astype(jnp.bfloat16)          # (H, S, hd)
    kh = split_heads(qkv[:, d_model:2 * d_model]).astype(jnp.bfloat16)
    vh = split_heads(qkv[:, 2 * d_model:]).astype(jnp.bfloat16)

    sc = jnp.einsum('hqd,hkd->hqk', qh, kh,
                    preferred_element_type=jnp.float32) * scale      # (H, S, S)
    mx = jnp.max(sc, axis=-1, keepdims=True)
    # TODO(synk): on v6e/v7x compute exp on bf16 inputs (EUP bf16); kept f32
    # here for v5e portability.
    e = jnp.exp(sc - mx)
    lsum = jnp.sum(e, axis=-1, keepdims=True)
    pr = e * pl.reciprocal(lsum, approx=True)                        # (H, S, S)
    ao = jnp.einsum('hqk,hkd->hqd', pr.astype(jnp.bfloat16), vh,
                    preferred_element_type=jnp.float32)              # (H, S, hd)

    # recombine heads into a pre-allocated VMEM scratch (no lane concatenate)
    for i in range(num_heads):
        attn_sc[:, i * head_dim:(i + 1) * head_dim] = ao[i]

    # ---- attention output projection + residual ----
    h1 = x + jnp.dot(attn_sc[...].astype(jnp.bfloat16), projw_ref[0],
                     preferred_element_type=jnp.float32) + projb_ref[0]

    # ---- LayerNorm 2 + MLP + residual ----
    m2 = jnp.sum(h1, axis=-1, keepdims=True) * inv_d
    q2 = jnp.sum(h1 * h1, axis=-1, keepdims=True) * inv_d
    xn2 = (h1 - m2) * jax.lax.rsqrt(q2 - m2 * m2 + LN_EPS) * ln2g_ref[0] + ln2b_ref[0]
    f1 = jnp.dot(xn2.astype(jnp.bfloat16), fc1w_ref[0],
                 preferred_element_type=jnp.float32) + fc1b_ref[0]
    # TODO(synk): HF DINOv2 uses exact erf GELU; tanh approximation used here.
    f1 = jax.nn.gelu(f1, approximate=True)
    f2 = jnp.dot(f1.astype(jnp.bfloat16), fc2w_ref[0],
                 preferred_element_type=jnp.float32) + fc2b_ref[0]
    h_new = h1 + f2
    h_sc[...] = h_new                                    # carry to next layer

    # ---- final layer only: features / cls-attention map / per-patch depth ----
    @pl.when(l == n_layers - 1)
    def _():
        # head-mean of the cls query row of the LAST layer's attention probs,
        # exactly normalized (approx reciprocal kept only on the value path).
        cls_e = e[:, 0, :]                               # (H, S)
        cls_p = cls_e / lsum[:, 0, :]
        attnmap_ref[0] = jnp.mean(cls_p, axis=0, keepdims=True)       # (1, S)

        cls_tok = h_new[0:1, :]                          # (1, D)
        patch = h_new[1:, :]                             # (P, D)
        pmean = jnp.mean(patch, axis=0, keepdims=True)
        feat_ref[0] = jnp.concatenate([cls_tok, pmean], axis=-1)      # (1, 2D)

        # depth head: lane-dense (1, P) row instead of an (M, 1) matmul
        dpt = jax.lax.dot_general(dw_ref[...], patch, (((1,), (1,)), ((), ())),
                                  preferred_element_type=jnp.float32) + db_ref[0]
        depth_ref[0] = jnp.maximum(dpt, 0.0)                          # (1, P)


def vit_encoder(h0, params):
    n, s, d = h0.shape
    p = s - 1
    kernel = functools.partial(_vit_encoder_kernel, num_heads=NUM_HEADS,
                               head_dim=HEAD_DIM,
                               scale=1.0 / math.sqrt(HEAD_DIM))
    layer_idx = lambda b, l: (l, 0, 0)
    batch_idx = lambda b, l: (b, 0, 0)
    return pl.pallas_call(
        kernel,
        out_shape=(jax.ShapeDtypeStruct((n, 1, 2 * d), jnp.float32),   # features
                   jax.ShapeDtypeStruct((n, 1, s), jnp.float32),       # cls attn
                   jax.ShapeDtypeStruct((n, 1, p), jnp.float32)),      # depth/patch
        grid_spec=pltpu.PrefetchScalarGridSpec(
            num_scalar_prefetch=0,
            grid=(n, NUM_LAYERS),
            in_specs=[
                pl.BlockSpec((1, s, d), batch_idx),                    # h0
                pl.BlockSpec((1, 1, d), layer_idx),                    # ln1_g
                pl.BlockSpec((1, 1, d), layer_idx),                    # ln1_b
                pl.BlockSpec((1, d, 3 * d), layer_idx),                # qkv_w
                pl.BlockSpec((1, 1, 3 * d), layer_idx),                # qkv_b
                pl.BlockSpec((1, d, d), layer_idx),                    # proj_w
                pl.BlockSpec((1, 1, d), layer_idx),                    # proj_b
                pl.BlockSpec((1, 1, d), layer_idx),                    # ln2_g
                pl.BlockSpec((1, 1, d), layer_idx),                    # ln2_b
                pl.BlockSpec((1, d, MLP_DIM), layer_idx),              # fc1_w
                pl.BlockSpec((1, 1, MLP_DIM), layer_idx),              # fc1_b
                pl.BlockSpec((1, MLP_DIM, d), layer_idx),              # fc2_w
                pl.BlockSpec((1, 1, d), layer_idx),                    # fc2_b
                pl.BlockSpec((1, d), lambda b, l: (0, 0)),             # depth_w
                pl.BlockSpec(memory_space=pltpu.MemorySpace.SMEM),     # depth_b
            ],
            out_specs=(pl.BlockSpec((1, 1, 2 * d), batch_idx),
                       pl.BlockSpec((1, 1, s), batch_idx),
                       pl.BlockSpec((1, 1, p), batch_idx)),
            scratch_shapes=[pltpu.VMEM((s, d), jnp.float32),   # h carry
                            pltpu.VMEM((s, d), jnp.float32)],  # attn recombine
        ),
        compiler_params=pltpu.CompilerParams(
            dimension_semantics=("parallel", "arbitrary")),
    )(h0, params["ln1_g"], params["ln1_b"], params["qkv_w"], params["qkv_b"],
      params["proj_w"], params["proj_b"], params["ln2_g"], params["ln2_b"],
      params["fc1_w"], params["fc1_b"], params["fc2_w"], params["fc2_b"],
      params["depth_w"], params["depth_b"])


# ----------------------------------------------------------------------------
# Model (synthetic DINOv2-style backbone + simplified depth head)
# ----------------------------------------------------------------------------
def init_params(key):
    def nrm(k, shape, scale=0.02, dtype=jnp.float32):
        return (scale * jax.random.normal(k, shape, jnp.float32)).astype(dtype)

    keys = iter(jax.random.split(key, 16))
    L, D, M = NUM_LAYERS, HIDDEN, MLP_DIM
    return {
        # matmul weights stored in bf16 (MXU operands; halves HBM traffic)
        "patch_w": nrm(next(keys), (3 * PATCH * PATCH, D), dtype=jnp.bfloat16),
        "patch_b": jnp.zeros((1, D), jnp.float32),
        "cls_token": nrm(next(keys), (1, 1, D)),
        "pos_emb": nrm(next(keys), (1, SEQ, D)),
        "depth_w": nrm(next(keys), (1, D)),
        "depth_b": jnp.zeros((1,), jnp.float32),
        # per-layer weights stacked on a leading layer axis; streamed by the
        # fused encoder kernel (layer l+1 prefetched while layer l computes).
        "ln1_g": jnp.ones((L, 1, D), jnp.float32),
        "ln1_b": jnp.zeros((L, 1, D), jnp.float32),
        "qkv_w": nrm(next(keys), (L, D, 3 * D), dtype=jnp.bfloat16),
        "qkv_b": jnp.zeros((L, 1, 3 * D), jnp.float32),
        "proj_w": nrm(next(keys), (L, D, D), dtype=jnp.bfloat16),
        "proj_b": jnp.zeros((L, 1, D), jnp.float32),
        "ln2_g": jnp.ones((L, 1, D), jnp.float32),
        "ln2_b": jnp.zeros((L, 1, D), jnp.float32),
        "fc1_w": nrm(next(keys), (L, D, M), dtype=jnp.bfloat16),
        "fc1_b": jnp.zeros((L, 1, M), jnp.float32),
        "fc2_w": nrm(next(keys), (L, M, D), dtype=jnp.bfloat16),
        "fc2_b": jnp.zeros((L, 1, D), jnp.float32),
    }


def image_depth_anything_encoder(image, params):
    """Forward pass. image: (N, 3, H, W) float32, NCHW."""
    n = image.shape[0]

    # 1) bicubic resize to TARGET + ImageNet normalization (one fused kernel,
    #    normalization folded into a scale/bias epilogue); bf16 output feeds
    #    the patch-embedding matmul directly.
    wh = _bicubic_matrix(TARGET_H, image.shape[2])
    wwt = _bicubic_matrix(TARGET_W, image.shape[3]).T
    inv_std = 1.0 / IMAGENET_STD
    proc = resize_scale_bias(image, wh, wwt,
                             jnp.asarray(inv_std),
                             jnp.asarray(-IMAGENET_MEAN * inv_std),
                             out_dtype=jnp.bfloat16)          # (N,3,Ht,Wt) bf16

    # 2) patchify (XLA glue transpose, already bf16) + row-tiled patch embedding
    patches = (proc.reshape(n, 3, PH, PATCH, PW, PATCH)
               .transpose(0, 2, 4, 1, 3, 5)
               .reshape(n * NUM_PATCHES, 3 * PATCH * PATCH))
    emb = dense_rows(patches, params["patch_w"], params["patch_b"])
    emb = emb.reshape(n, NUM_PATCHES, HIDDEN)
    cls = jnp.broadcast_to(params["cls_token"], (n, 1, HIDDEN))
    h0 = jnp.concatenate([cls, emb], axis=1) + params["pos_emb"]   # (N, S, D)

    # 3-5) all transformer layers + feature pooling + cls-attention + per-patch
    #      depth in ONE fused pallas_call; h never round-trips HBM.
    feats, cls_attn, depth_p = vit_encoder(h0, params)

    cls_attention = cls_attn[:, 0, 1:].reshape(n, PH, PW)

    # 6) bilinear upsample of per-patch depth to the processed-image size
    wh_d = _bilinear_matrix(TARGET_H, PH)
    wwt_d = _bilinear_matrix(TARGET_W, PW).T
    depth = resize_scale_bias(depth_p.reshape(n, 1, PH, PW), wh_d, wwt_d,
                              jnp.ones((1,), jnp.float32),
                              jnp.zeros((1,), jnp.float32))[:, 0]   # (N, Ht, Wt)

    return {
        "image_features": feats[:, 0],
        "image_attentions": cls_attention,
        "depth": depth,
    }


if __name__ == "__main__":
    key = jax.random.PRNGKey(0)
    pkey, xkey = jax.random.split(key)
    params = init_params(pkey)
    image = jax.random.uniform(xkey, (2, 3, 16, 16), jnp.float32)

    fwd = jax.jit(image_depth_anything_encoder)
    out = fwd(image, params)
    out = jax.tree_util.tree_map(jax.block_until_ready, out)

    assert out["image_features"].shape == (2, 2 * HIDDEN)
    assert out["image_attentions"].shape == (2, PH, PW)
    assert out["depth"].shape == (2, TARGET_H, TARGET_W)
    assert all(bool(jnp.all(jnp.isfinite(v))) for v in out.values())
    print("KERNEL_OK")
</pallas_src>

<mosaic_0001>
module attributes {stable_mosaic.version = 11 : i64} {
  func.func @_resize_norm_kernel(%arg0: i32, %arg1: i32, %arg2: memref<1x1x16x16xf32, #tpu.memory_space<vmem>>, %arg3: memref<28x16xf32, #tpu.memory_space<vmem>>, %arg4: memref<16x42xf32, #tpu.memory_space<vmem>>, %arg5: memref<3xf32, #tpu.memory_space<smem>>, %arg6: memref<3xf32, #tpu.memory_space<smem>>, %arg7: memref<1x1x28x42xbf16, #tpu.memory_space<vmem>>) attributes {dimension_semantics = [#tpu.dimension_semantics<parallel>, #tpu.dimension_semantics<parallel>], iteration_bounds = array<i64: 2, 3>, scalar_prefetch = 0 : i64, scratch_operands = 0 : i64, tpu.core_type = #tpu.core_type<tc>, window_params = [{transform_indices = @transform_0, window_bounds = array<i64: 1, 1, 16, 16>}, {pipeline_mode = #tpu.pipeline_mode<synchronous>, transform_indices = @transform_1, window_bounds = array<i64: 28, 16>}, {pipeline_mode = #tpu.pipeline_mode<synchronous>, transform_indices = @transform_2, window_bounds = array<i64: 16, 42>}, {transform_indices = @transform_3, window_bounds = array<i64: 3>}, {transform_indices = @transform_4, window_bounds = array<i64: 3>}, {transform_indices = @transform_5, window_bounds = array<i64: 1, 1, 28, 42>}]} {
    %c0 = arith.constant 0 : index
    %c0_0 = arith.constant 0 : index
    %c0_1 = arith.constant 0 : index
    %c0_2 = arith.constant 0 : index
    %0 = vector.load %arg2[%c0, %c0_0, %c0_1, %c0_2] : memref<1x1x16x16xf32, #tpu.memory_space<vmem>>, vector<1x1x16x16xf32>
    %1 = vector.shape_cast %0 : vector<1x1x16x16xf32> to vector<16x16xf32>
    %c0_3 = arith.constant 0 : index
    %c0_4 = arith.constant 0 : index
    %2 = vector.load %arg3[%c0_3, %c0_4] : memref<28x16xf32, #tpu.memory_space<vmem>>, vector<28x16xf32>
    %cst = arith.constant dense<0.000000e+00> : vector<28x16xf32>
    %3 = tpu.matmul %2, %1, %cst {dimension_numbers = #tpu.dot_dimension_numbers<[1], [0], [0], [1], [0, 0, 1, 1], [], []>} : vector<28x16xf32>, vector<16x16xf32>, vector<28x16xf32> -> vector<28x16xf32>
    %c0_5 = arith.constant 0 : index
    %c0_6 = arith.constant 0 : index
    %4 = vector.load %arg4[%c0_5, %c0_6] : memref<16x42xf32, #tpu.memory_space<vmem>>, vector<16x42xf32>
    %cst_7 = arith.constant dense<0.000000e+00> : vector<28x42xf32>
    %5 = tpu.matmul %3, %4, %cst_7 {dimension_numbers = #tpu.dot_dimension_numbers<[1], [0], [0], [1], [0, 0, 1, 1], [], []>} : vector<28x16xf32>, vector<16x42xf32>, vector<28x42xf32> -> vector<28x42xf32>
    %6 = arith.index_cast %arg1 : i32 to index
    %7 = memref.load %arg5[%6] : memref<3xf32, #tpu.memory_space<smem>>
    %8 = vector.broadcast %7 : f32 to vector<28x42xf32>
    %9 = arith.mulf %5, %8 : vector<28x42xf32>
    %10 = arith.index_cast %arg1 : i32 to index
    %11 = memref.load %arg6[%10] : memref<3xf32, #tpu.memory_space<smem>>
    %12 = vector.broadcast %11 : f32 to vector<28x42xf32>
    %13 = arith.addf %9, %12 : vector<28x42xf32>
    %14 = arith.truncf %13 : vector<28x42xf32> to vector<28x42xbf16>
    %c0_8 = arith.constant 0 : index
    %c0_9 = arith.constant 0 : index
    %c0_10 = arith.constant 0 : index
    %c0_11 = arith.constant 0 : index
    %15 = vector.load %arg7[%c0_8, %c0_9, %c0_10, %c0_11] : memref<1x1x28x42xbf16, #tpu.memory_space<vmem>>, vector<1x1x28x42xbf16>
    %16 = vector.shape_cast %15 : vector<1x1x28x42xbf16> to vector<28x42xbf16>
    %17 = vector.shape_cast %14 : vector<28x42xbf16> to vector<1x1x28x42xbf16>
    tpu.vector_store %arg7[%c0_8, %c0_9, %c0_10, %c0_11], %17 {strides = array<i32>} : memref<1x1x28x42xbf16, #tpu.memory_space<vmem>>, vector<1x1x28x42xbf16>,
    return
  }
  func.func @transform_0(%arg0: i32, %arg1: i32) -> (i32, i32, i32, i32) {
    %c0_i32 = arith.constant 0 : i32
    %c0_i32_0 = arith.constant 0 : i32
    %c0_i32_1 = arith.constant 0 : i32
    return %arg0, %arg1, %c0_i32, %c0_i32_0 : i32, i32, i32, i32
  }
  func.func @transform_1(%arg0: i32, %arg1: i32) -> (i32, i32) {
    %c0_i32 = arith.constant 0 : i32
    %c0_i32_0 = arith.constant 0 : i32
    %c0_i32_1 = arith.constant 0 : i32
    return %c0_i32, %c0_i32_0 : i32, i32
  }
  func.func @transform_2(%arg0: i32, %arg1: i32) -> (i32, i32) {
    %c0_i32 = arith.constant 0 : i32
    %c0_i32_0 = arith.constant 0 : i32
    %c0_i32_1 = arith.constant 0 : i32
    return %c0_i32, %c0_i32_0 : i32, i32
  }
  func.func @transform_3(%arg0: i32, %arg1: i32) -> i32 {
    %c0_i32 = arith.constant 0 : i32
    %c0_i32_0 = arith.constant 0 : i32
    return %c0_i32 : i32
  }
  func.func @transform_4(%arg0: i32, %arg1: i32) -> i32 {
    %c0_i32 = arith.constant 0 : i32
    %c0_i32_0 = arith.constant 0 : i32
    return %c0_i32 : i32
  }
  func.func @transform_5(%arg0: i32, %arg1: i32) -> (i32, i32, i32, i32) {
    %c0_i32 = arith.constant 0 : i32
    %c0_i32_0 = arith.constant 0 : i32
    %c0_i32_1 = arith.constant 0 : i32
    return %arg0, %arg1, %c0_i32, %c0_i32_0 : i32, i32, i32, i32
  }
}

module attributes {stable_mosaic.version = 11 : i64} {
  func.func @_dense_kernel(%arg0: i32, %arg1: memref<12x588xbf16, #tpu.memory_space<vmem>>, %arg2: memref<588x32xbf16, #tpu.memory_space<vmem>>, %arg3: memref<1x32xf32, #tpu.memory_space<vmem>>, %arg4: memref<12x32xf32, #tpu.memory_space<vmem>>) attributes {dimension_semantics = [#tpu.dimension_semantics<parallel>], iteration_bounds = array<i64: 1>, scalar_prefetch = 0 : i64, scratch_operands = 0 : i64, tpu.core_type = #tpu.core_type<tc>, window_params = [{transform_indices = @transform_0, window_bounds = array<i64: 12, 588>}, {pipeline_mode = #tpu.pipeline_mode<synchronous>, transform_indices = @transform_1, window_bounds = array<i64: 588, 32>}, {pipeline_mode = #tpu.pipeline_mode<synchronous>, transform_indices = @transform_2, window_bounds = array<i64: 1, 32>}, {transform_indices = @transform_3, window_bounds = array<i64: 12, 32>}]} {
    %c0 = arith.constant 0 : index
    %c0_0 = arith.constant 0 : index
    %0 = vector.load %arg1[%c0, %c0_0] : memref<12x588xbf16, #tpu.memory_space<vmem>>, vector<12x588xbf16>
    %c0_1 = arith.constant 0 : index
    %c0_2 = arith.constant 0 : index
    %1 = vector.load %arg2[%c0_1, %c0_2] : memref<588x32xbf16, #tpu.memory_space<vmem>>, vector<588x32xbf16>
    %cst = arith.constant dense<0.000000e+00> : vector<12x32xf32>
    %2 = tpu.matmul %0, %1, %cst {dimension_numbers = #tpu.dot_dimension_numbers<[1], [0], [0], [1], [0, 0, 1, 1], [], []>} : vector<12x588xbf16>, vector<588x32xbf16>, vector<12x32xf32> -> vector<12x32xf32>
    %c0_3 = arith.constant 0 : index
    %c0_4 = arith.constant 0 : index
    %3 = vector.load %arg3[%c0_3, %c0_4] : memref<1x32xf32, #tpu.memory_space<vmem>>, vector<1x32xf32>
    %4 = vector.broadcast %3 : vector<1x32xf32> to vector<12x32xf32>
    %5 = arith.addf %2, %4 : vector<12x32xf32>
    %c0_5 = arith.constant 0 : index
    %c0_6 = arith.constant 0 : index
    %6 = vector.load %arg4[%c0_5, %c0_6] : memref<12x32xf32, #tpu.memory_space<vmem>>, vector<12x32xf32>
    tpu.vector_store %arg4[%c0_5, %c0_6], %5 {strides = array<i32>} : memref<12x32xf32, #tpu.memory_space<vmem>>, vector<12x32xf32>,
    return
  }
  func.func @transform_0(%arg0: i32) -> (i32, i32) {
    %c0_i32 = arith.constant 0 : i32
    %c0_i32_0 = arith.constant 0 : i32
    return %arg0, %c0_i32 : i32, i32
  }
  func.func @transform_1(%arg0: i32) -> (i32, i32) {
    %c0_i32 = arith.constant 0 : i32
    %c0_i32_0 = arith.constant 0 : i32
    %c0_i32_1 = arith.constant 0 : i32
    return %c0_i32, %c0_i32_0 : i32, i32
  }
  func.func @transform_2(%arg0: i32) -> (i32, i32) {
    %c0_i32 = arith.constant 0 : i32
    %c0_i32_0 = arith.constant 0 : i32
    %c0_i32_1 = arith.constant 0 : i32
    return %c0_i32, %c0_i32_0 : i32, i32
  }
  func.func @transform_3(%arg0: i32) -> (i32, i32) {
    %c0_i32 = arith.constant 0 : i32
    %c0_i32_0 = arith.constant 0 : i32
    return %arg0, %c0_i32 : i32, i32
  }
}

module attributes {stable_mosaic.version = 11 : i64} {
  func.func @_vit_encoder_kernel(%arg0: i32, %arg1: i32, %arg2: memref<1x7x32xf32, #tpu.memory_space<vmem>>, %arg3: memref<1x1x32xf32, #tpu.memory_space<vmem>>, %arg4: memref<1x1x32xf32, #tpu.memory_space<vmem>>, %arg5: memref<1x32x96xbf16, #tpu.memory_space<vmem>>, %arg6: memref<1x1x96xf32, #tpu.memory_space<vmem>>, %arg7: memref<1x32x32xbf16, #tpu.memory_space<vmem>>, %arg8: memref<1x1x32xf32, #tpu.memory_space<vmem>>, %arg9: memref<1x1x32xf32, #tpu.memory_space<vmem>>, %arg10: memref<1x1x32xf32, #tpu.memory_space<vmem>>, %arg11: memref<1x32x128xbf16, #tpu.memory_space<vmem>>, %arg12: memref<1x1x128xf32, #tpu.memory_space<vmem>>, %arg13: memref<1x128x32xbf16, #tpu.memory_space<vmem>>, %arg14: memref<1x1x32xf32, #tpu.memory_space<vmem>>, %arg15: memref<1x32xf32, #tpu.memory_space<vmem>>, %arg16: memref<1xf32, #tpu.memory_space<smem>>, %arg17: memref<1x1x64xf32, #tpu.memory_space<vmem>>, %arg18: memref<1x1x7xf32, #tpu.memory_space<vmem>>, %arg19: memref<1x1x6xf32, #tpu.memory_space<vmem>>, %arg20: memref<7x32xf32, #tpu.memory_space<vmem>>, %arg21: memref<7x32xf32, #tpu.memory_space<vmem>>) attributes {dimension_semantics = [#tpu.dimension_semantics<parallel>, #tpu.dimension_semantics<arbitrary>], iteration_bounds = array<i64: 2, 2>, scalar_prefetch = 0 : i64, scratch_operands = 2 : i64, tpu.core_type = #tpu.core_type<tc>, window_params = [{transform_indices = @transform_0, window_bounds = array<i64: 1, 7, 32>}, {transform_indices = @transform_1, window_bounds = array<i64: 1, 1, 32>}, {transform_indices = @transform_2, window_bounds = array<i64: 1, 1, 32>}, {transform_indices = @transform_3, window_bounds = array<i64: 1, 32, 96>}, {transform_indices = @transform_4, window_bounds = array<i64: 1, 1, 96>}, {transform_indices = @transform_5, window_bounds = array<i64: 1, 32, 32>}, {transform_indices = @transform_6, window_bounds = array<i64: 1, 1, 32>}, {transform_indices = @transform_7, window_bounds = array<i64: 1, 1, 32>}, {transform_indices = @transform_8, window_bounds = array<i64: 1, 1, 32>}, {transform_indices = @transform_9, window_bounds = array<i64: 1, 32, 128>}, {transform_indices = @transform_10, window_bounds = array<i64: 1, 1, 128>}, {transform_indices = @transform_11, window_bounds = array<i64: 1, 128, 32>}, {transform_indices = @transform_12, window_bounds = array<i64: 1, 1, 32>}, {pipeline_mode = #tpu.pipeline_mode<synchronous>, transform_indices = @transform_13, window_bounds = array<i64: 1, 32>}, {transform_indices = @transform_14, window_bounds = array<i64: 1>}, {transform_indices = @transform_15, window_bounds = array<i64: 1, 1, 64>}, {transform_indices = @transform_16, window_bounds = array<i64: 1, 1, 7>}, {transform_indices = @transform_17, window_bounds = array<i64: 1, 1, 6>}]} {
    %c0_i32 = arith.constant 0 : i32
    %0 = arith.cmpi eq, %arg1, %c0_i32 : i32
    %1 = arith.extui %0 : i1 to i32
    %c0_i32_0 = arith.constant 0 : i32
    %2 = arith.cmpi ne, %1, %c0_i32_0 : i32
    scf.if %2 {
      %c0_68 = arith.constant 0 : index
      %c0_69 = arith.constant 0 : index
      %c0_70 = arith.constant 0 : index
      %150 = vector.load %arg2[%c0_68, %c0_69, %c0_70] : memref<1x7x32xf32, #tpu.memory_space<vmem>>, vector<1x7x32xf32>
      %151 = vector.shape_cast %150 : vector<1x7x32xf32> to vector<7x32xf32>
      %c0_71 = arith.constant 0 : index
      %c0_72 = arith.constant 0 : index
      %152 = vector.load %arg20[%c0_71, %c0_72] : memref<7x32xf32, #tpu.memory_space<vmem>>, vector<7x32xf32>
      tpu.vector_store %arg20[%c0_71, %c0_72], %151 {strides = array<i32>} : memref<7x32xf32, #tpu.memory_space<vmem>>, vector<7x32xf32>,
    } else {
    }
    %c0 = arith.constant 0 : index
    %c0_1 = arith.constant 0 : index
    %3 = vector.load %arg20[%c0, %c0_1] : memref<7x32xf32, #tpu.memory_space<vmem>>, vector<7x32xf32>
    %cst = arith.constant dense<0.000000e+00> : vector<7xf32>
    %4 = vector.multi_reduction <add>, %3, %cst [1] : vector<7x32xf32> to vector<7xf32>
    %5 = vector.shape_cast %4 : vector<7xf32> to vector<7x1xf32>
    %cst_2 = arith.constant 3.125000e-02 : f32
    %6 = vector.broadcast %cst_2 : f32 to vector<7x1xf32>
    %7 = arith.mulf %5, %6 : vector<7x1xf32>
    %8 = arith.mulf %3, %3 : vector<7x32xf32>
    %cst_3 = arith.constant dense<0.000000e+00> : vector<7xf32>
    %9 = vector.multi_reduction <add>, %8, %cst_3 [1] : vector<7x32xf32> to vector<7xf32>
    %10 = vector.shape_cast %9 : vector<7xf32> to vector<7x1xf32>
    %cst_4 = arith.constant 3.125000e-02 : f32
    %11 = vector.broadcast %cst_4 : f32 to vector<7x1xf32>
    %12 = arith.mulf %10, %11 : vector<7x1xf32>
    %13 = vector.broadcast %7 : vector<7x1xf32> to vector<7x32xf32>
    %14 = arith.subf %3, %13 : vector<7x32xf32>
    %15 = arith.mulf %7, %7 : vector<7x1xf32>
    %16 = arith.subf %12, %15 : vector<7x1xf32>
    %cst_5 = arith.constant 9.99999997E-7 : f32
    %17 = vector.broadcast %cst_5 : f32 to vector<7x1xf32>
    %18 = arith.addf %16, %17 : vector<7x1xf32>
    %19 = math.rsqrt %18 : vector<7x1xf32>
    %20 = vector.broadcast %19 : vector<7x1xf32> to vector<7x32xf32>
    %21 = arith.mulf %14, %20 : vector<7x32xf32>
    %c0_6 = arith.constant 0 : index
    %c0_7 = arith.constant 0 : index
    %c0_8 = arith.constant 0 : index
    %22 = vector.load %arg3[%c0_6, %c0_7, %c0_8] : memref<1x1x32xf32, #tpu.memory_space<vmem>>, vector<1x1x32xf32>
    %23 = vector.shape_cast %22 : vector<1x1x32xf32> to vector<1x32xf32>
    %24 = vector.broadcast %23 : vector<1x32xf32> to vector<7x32xf32>
    %25 = arith.mulf %21, %24 : vector<7x32xf32>
    %c0_9 = arith.constant 0 : index
    %c0_10 = arith.constant 0 : index
    %c0_11 = arith.constant 0 : index
    %26 = vector.load %arg4[%c0_9, %c0_10, %c0_11] : memref<1x1x32xf32, #tpu.memory_space<vmem>>, vector<1x1x32xf32>
    %27 = vector.shape_cast %26 : vector<1x1x32xf32> to vector<1x32xf32>
    %28 = vector.broadcast %27 : vector<1x32xf32> to vector<7x32xf32>
    %29 = arith.addf %25, %28 : vector<7x32xf32>
    %30 = arith.truncf %29 : vector<7x32xf32> to vector<7x32xbf16>
    %c0_12 = arith.constant 0 : index
    %c0_13 = arith.constant 0 : index
    %c0_14 = arith.constant 0 : index
    %31 = vector.load %arg5[%c0_12, %c0_13, %c0_14] : memref<1x32x96xbf16, #tpu.memory_space<vmem>>, vector<1x32x96xbf16>
    %32 = vector.shape_cast %31 : vector<1x32x96xbf16> to vector<32x96xbf16>
    %cst_15 = arith.constant dense<0.000000e+00> : vector<7x96xf32>
    %33 = tpu.matmul %30, %32, %cst_15 {dimension_numbers = #tpu.dot_dimension_numbers<[1], [0], [0], [1], [0, 0, 1, 1], [], []>} : vector<7x32xbf16>, vector<32x96xbf16>, vector<7x96xf32> -> vector<7x96xf32>
    %c0_16 = arith.constant 0 : index
    %c0_17 = arith.constant 0 : index
    %c0_18 = arith.constant 0 : index
    %34 = vector.load %arg6[%c0_16, %c0_17, %c0_18] : memref<1x1x96xf32, #tpu.memory_space<vmem>>, vector<1x1x96xf32>
    %35 = vector.shape_cast %34 : vector<1x1x96xf32> to vector<1x96xf32>
    %36 = vector.broadcast %35 : vector<1x96xf32> to vector<7x96xf32>
    %37 = arith.addf %33, %36 : vector<7x96xf32>
    %38 = vector.extract_strided_slice %37 {offsets = [0, 0], sizes = [7, 32], strides = [1, 1]} : vector<7x96xf32> to vector<7x32xf32>
    %39 = vector.extract_strided_slice %38 {offsets = [0, 0], sizes = [7, 16], strides = [1, 1]} : vector<7x32xf32> to vector<7x16xf32>
    %40 = vector.extract_strided_slice %38 {offsets = [0, 16], sizes = [7, 16], strides = [1, 1]} : vector<7x32xf32> to vector<7x16xf32>
    %41 = vector.shape_cast %39 : vector<7x16xf32> to vector<1x7x16xf32>
    %42 = vector.shape_cast %40 : vector<7x16xf32> to vector<1x7x16xf32>
    %43 = tpu.concatenate %41, %42 in 0 : vector<1x7x16xf32>, vector<1x7x16xf32> -> vector<2x7x16xf32>
    %44 = arith.truncf %43 : vector<2x7x16xf32> to vector<2x7x16xbf16>
    %45 = vector.extract_strided_slice %37 {offsets = [0, 32], sizes = [7, 32], strides = [1, 1]} : vector<7x96xf32> to vector<7x32xf32>
    %46 = vector.extract_strided_slice %45 {offsets = [0, 0], sizes = [7, 16], strides = [1, 1]} : vector<7x32xf32> to vector<7x16xf32>
    %47 = vector.extract_strided_slice %45 {offsets = [0, 16], sizes = [7, 16], strides = [1, 1]} : vector<7x32xf32> to vector<7x16xf32>
    %48 = vector.shape_cast %46 : vector<7x16xf32> to vector<1x7x16xf32>
    %49 = vector.shape_cast %47 : vector<7x16xf32> to vector<1x7x16xf32>
    %50 = tpu.concatenate %48, %49 in 0 : vector<1x7x16xf32>, vector<1x7x16xf32> -> vector<2x7x16xf32>
    %51 = arith.truncf %50 : vector<2x7x16xf32> to vector<2x7x16xbf16>
    %52 = vector.extract_strided_slice %37 {offsets = [0, 64], sizes = [7, 32], strides = [1, 1]} : vector<7x96xf32> to vector<7x32xf32>
    %53 = vector.extract_strided_slice %52 {offsets = [0, 0], sizes = [7, 16], strides = [1, 1]} : vector<7x32xf32> to vector<7x16xf32>
    %54 = vector.extract_strided_slice %52 {offsets = [0, 16], sizes = [7, 16], strides = [1, 1]} : vector<7x32xf32> to vector<7x16xf32>
    %55 = vector.shape_cast %53 : vector<7x16xf32> to vector<1x7x16xf32>
    %56 = vector.shape_cast %54 : vector<7x16xf32> to vector<1x7x16xf32>
    %57 = tpu.concatenate %55, %56 in 0 : vector<1x7x16xf32>, vector<1x7x16xf32> -> vector<2x7x16xf32>
    %58 = arith.truncf %57 : vector<2x7x16xf32> to vector<2x7x16xbf16>
    "tpu.trace_start"() <{level = 10 : i32, message = "hqd,hkd->hqk"}> : () -> ()
    %cst_19 = arith.constant dense<0.000000e+00> : vector<2x7x7xf32>
    %59 = tpu.matmul %44, %51, %cst_19 {dimension_numbers = #tpu.dot_dimension_numbers<[2], [2], [1], [1], [0, 0, 0, 1, 1, 1], [0], [0]>} : vector<2x7x16xbf16>, vector<2x7x16xbf16>, vector<2x7x7xf32> -> vector<2x7x7xf32>
    "tpu.trace_stop"() : () -> ()
    %cst_20 = arith.constant 2.500000e-01 : f32
    %60 = vector.broadcast %cst_20 : f32 to vector<2x7x7xf32>
    %61 = arith.mulf %59, %60 : vector<2x7x7xf32>
    %cst_21 = arith.constant dense<0xFF800000> : vector<2x7xf32>
    %62 = vector.multi_reduction <maximumf>, %61, %cst_21 [2] : vector<2x7x7xf32> to vector<2x7xf32>
    %63 = vector.shape_cast %62 : vector<2x7xf32> to vector<2x7x1xf32>
    %64 = vector.broadcast %63 : vector<2x7x1xf32> to vector<2x7x7xf32>
    %65 = arith.subf %61, %64 : vector<2x7x7xf32>
    %66 = math.exp %65 : vector<2x7x7xf32>
    %cst_22 = arith.constant dense<0.000000e+00> : vector<2x7xf32>
    %67 = vector.multi_reduction <add>, %66, %cst_22 [2] : vector<2x7x7xf32> to vector<2x7xf32>
    %68 = vector.shape_cast %67 : vector<2x7xf32> to vector<2x7x1xf32>
    %69 = tpu.reciprocal %68 {approx = true} : vector<2x7x1xf32> -> vector<2x7x1xf32>
    %70 = vector.broadcast %69 : vector<2x7x1xf32> to vector<2x7x7xf32>
    %71 = arith.mulf %66, %70 : vector<2x7x7xf32>
    %72 = arith.truncf %71 : vector<2x7x7xf32> to vector<2x7x7xbf16>
    "tpu.trace_start"() <{level = 10 : i32, message = "hqk,hkd->hqd"}> : () -> ()
    %cst_23 = arith.constant dense<0.000000e+00> : vector<2x7x16xf32>
    %73 = tpu.matmul %72, %58, %cst_23 {dimension_numbers = #tpu.dot_dimension_numbers<[2], [1], [1], [2], [0, 0, 0, 1, 1, 2], [0], [0]>} : vector<2x7x7xbf16>, vector<2x7x16xbf16>, vector<2x7x16xf32> -> vector<2x7x16xf32>
    "tpu.trace_stop"() : () -> ()
    %74 = vector.extract_strided_slice %73 {offsets = [0, 0, 0], sizes = [1, 7, 16], strides = [1, 1, 1]} : vector<2x7x16xf32> to vector<1x7x16xf32>
    %75 = vector.shape_cast %74 : vector<1x7x16xf32> to vector<7x16xf32>
    %c0_24 = arith.constant 0 : index
    %c0_25 = arith.constant 0 : index
    %76 = vector.load %arg21[%c0_24, %c0_25] : memref<7x32xf32, #tpu.memory_space<vmem>>, vector<7x16xf32>
    tpu.vector_store %arg21[%c0_24, %c0_25], %75 {strides = array<i32>} : memref<7x32xf32, #tpu.memory_space<vmem>>, vector<7x16xf32>,
    %77 = vector.extract_strided_slice %73 {offsets = [1, 0, 0], sizes = [1, 7, 16], strides = [1, 1, 1]} : vector<2x7x16xf32> to vector<1x7x16xf32>
    %78 = vector.shape_cast %77 : vector<1x7x16xf32> to vector<7x16xf32>
    %c0_26 = arith.constant 0 : index
    %c16 = arith.constant 16 : index
    %79 = vector.load %arg21[%c0_26, %c16] : memref<7x32xf32, #tpu.memory_space<vmem>>, vector<7x16xf32>
    tpu.vector_store %arg21[%c0_26, %c16], %78 {strides = array<i32>} : memref<7x32xf32, #tpu.memory_space<vmem>>, vector<7x16xf32>,
    %c0_27 = arith.constant 0 : index
    %c0_28 = arith.constant 0 : index
    %80 = vector.load %arg21[%c0_27, %c0_28] : memref<7x32xf32, #tpu.memory_space<vmem>>, vector<7x32xf32>
    %81 = arith.truncf %80 : vector<7x32xf32> to vector<7x32xbf16>
    %c0_29 = arith.constant 0 : index
    %c0_30 = arith.constant 0 : index
    %c0_31 = arith.constant 0 : index
    %82 = vector.load %arg7[%c0_29, %c0_30, %c0_31] : memref<1x32x32xbf16, #tpu.memory_space<vmem>>, vector<1x32x32xbf16>
    %83 = vector.shape_cast %82 : vector<1x32x32xbf16> to vector<32x32xbf16>
    %cst_32 = arith.constant dense<0.000000e+00> : vector<7x32xf32>
    %84 = tpu.matmul %81, %83, %cst_32 {dimension_numbers = #tpu.dot_dimension_numbers<[1], [0], [0], [1], [0, 0, 1, 1], [], []>} : vector<7x32xbf16>, vector<32x32xbf16>, vector<7x32xf32> -> vector<7x32xf32>
    %85 = arith.addf %3, %84 : vector<7x32xf32>
    %c0_33 = arith.constant 0 : index
    %c0_34 = arith.constant 0 : index
    %c0_35 = arith.constant 0 : index
    %86 = vector.load %arg8[%c0_33, %c0_34, %c0_35] : memref<1x1x32xf32, #tpu.memory_space<vmem>>, vector<1x1x32xf32>
    %87 = vector.shape_cast %86 : vector<1x1x32xf32> to vector<1x32xf32>
    %88 = vector.broadcast %87 : vector<1x32xf32> to vector<7x32xf32>
    %89 = arith.addf %85, %88 : vector<7x32xf32>
    %cst_36 = arith.constant dense<0.000000e+00> : vector<7xf32>
    %90 = vector.multi_reduction <add>, %89, %cst_36 [1] : vector<7x32xf32> to vector<7xf32>
    %91 = vector.shape_cast %90 : vector<7xf32> to vector<7x1xf32>
    %cst_37 = arith.constant 3.125000e-02 : f32
    %92 = vector.broadcast %cst_37 : f32 to vector<7x1xf32>
    %93 = arith.mulf %91, %92 : vector<7x1xf32>
    %94 = arith.mulf %89, %89 : vector<7x32xf32>
    %cst_38 = arith.constant dense<0.000000e+00> : vector<7xf32>
    %95 = vector.multi_reduction <add>, %94, %cst_38 [1] : vector<7x32xf32> to vector<7xf32>
    %96 = vector.shape_cast %95 : vector<7xf32> to vector<7x1xf32>
    %cst_39 = arith.constant 3.125000e-02 : f32
    %97 = vector.broadcast %cst_39 : f32 to vector<7x1xf32>
    %98 = arith.mulf %96, %97 : vector<7x1xf32>
    %99 = vector.broadcast %93 : vector<7x1xf32> to vector<7x32xf32>
    %100 = arith.subf %89, %99 : vector<7x32xf32>
    %101 = arith.mulf %93, %93 : vector<7x1xf32>
    %102 = arith.subf %98, %101 : vector<7x1xf32>
    %cst_40 = arith.constant 9.99999997E-7 : f32
    %103 = vector.broadcast %cst_40 : f32 to vector<7x1xf32>
    %104 = arith.addf %102, %103 : vector<7x1xf32>
    %105 = math.rsqrt %104 : vector<7x1xf32>
    %106 = vector.broadcast %105 : vector<7x1xf32> to vector<7x32xf32>
    %107 = arith.mulf %100, %106 : vector<7x32xf32>
    %c0_41 = arith.constant 0 : index
    %c0_42 = arith.constant 0 : index
    %c0_43 = arith.constant 0 : index
    %108 = vector.load %arg9[%c0_41, %c0_42, %c0_43] : memref<1x1x32xf32, #tpu.memory_space<vmem>>, vector<1x1x32xf32>
    %109 = vector.shape_cast %108 : vector<1x1x32xf32> to vector<1x32xf32>
    %110 = vector.broadcast %109 : vector<1x32xf32> to vector<7x32xf32>
    %111 = arith.mulf %107, %110 : vector<7x32xf32>
    %c0_44 = arith.constant 0 : index
    %c0_45 = arith.constant 0 : index
    %c0_46 = arith.constant 0 : index
    %112 = vector.load %arg10[%c0_44, %c0_45, %c0_46] : memref<1x1x32xf32, #tpu.memory_space<vmem>>, vector<1x1x32xf32>
    %113 = vector.shape_cast %112 : vector<1x1x32xf32> to vector<1x32xf32>
    %114 = vector.broadcast %113 : vector<1x32xf32> to vector<7x32xf32>
    %115 = arith.addf %111, %114 : vector<7x32xf32>
    %116 = arith.truncf %115 : vector<7x32xf32> to vector<7x32xbf16>
    %c0_47 = arith.constant 0 : index
    %c0_48 = arith.constant 0 : index
    %c0_49 = arith.constant 0 : index
    %117 = vector.load %arg11[%c0_47, %c0_48, %c0_49] : memref<1x32x128xbf16, #tpu.memory_space<vmem>>, vector<1x32x128xbf16>
    %118 = vector.shape_cast %117 : vector<1x32x128xbf16> to vector<32x128xbf16>
    %cst_50 = arith.constant dense<0.000000e+00> : vector<7x128xf32>
    %119 = tpu.matmul %116, %118, %cst_50 {dimension_numbers = #tpu.dot_dimension_numbers<[1], [0], [0], [1], [0, 0, 1, 1], [], []>} : vector<7x32xbf16>, vector<32x128xbf16>, vector<7x128xf32> -> vector<7x128xf32>
    %c0_51 = arith.constant 0 : index
    %c0_52 = arith.constant 0 : index
    %c0_53 = arith.constant 0 : index
    %120 = vector.load %arg12[%c0_51, %c0_52, %c0_53] : memref<1x1x128xf32, #tpu.memory_space<vmem>>, vector<1x1x128xf32>
    %121 = vector.shape_cast %120 : vector<1x1x128xf32> to vector<1x128xf32>
    %122 = vector.broadcast %121 : vector<1x128xf32> to vector<7x128xf32>
    %123 = arith.addf %119, %122 : vector<7x128xf32>
    %124 = arith.mulf %123, %123 : vector<7x128xf32>
    %125 = arith.mulf %123, %124 : vector<7x128xf32>
    %cst_54 = arith.constant 4.471500e-02 : f32
    %126 = vector.broadcast %cst_54 : f32 to vector<7x128xf32>
    %127 = arith.mulf %126, %125 : vector<7x128xf32>
    %128 = arith.addf %123, %127 : vector<7x128xf32>
    %cst_55 = arith.constant 0.797884583 : f32
    %129 = vector.broadcast %cst_55 : f32 to vector<7x128xf32>
    %130 = arith.mulf %129, %128 : vector<7x128xf32>
    %131 = math.tanh %130 : vector<7x128xf32>
    %cst_56 = arith.constant 1.000000e+00 : f32
    %132 = vector.broadcast %cst_56 : f32 to vector<7x128xf32>
    %133 = arith.addf %132, %131 : vector<7x128xf32>
    %cst_57 = arith.constant 5.000000e-01 : f32
    %134 = vector.broadcast %cst_57 : f32 to vector<7x128xf32>
    %135 = arith.mulf %134, %133 : vector<7x128xf32>
    %136 = arith.mulf %123, %135 : vector<7x128xf32>
    %137 = arith.truncf %136 : vector<7x128xf32> to vector<7x128xbf16>
    %c0_58 = arith.constant 0 : index
    %c0_59 = arith.constant 0 : index
    %c0_60 = arith.constant 0 : index
    %138 = vector.load %arg13[%c0_58, %c0_59, %c0_60] : memref<1x128x32xbf16, #tpu.memory_space<vmem>>, vector<1x128x32xbf16>
    %139 = vector.shape_cast %138 : vector<1x128x32xbf16> to vector<128x32xbf16>
    %cst_61 = arith.constant dense<0.000000e+00> : vector<7x32xf32>
    %140 = tpu.matmul %137, %139, %cst_61 {dimension_numbers = #tpu.dot_dimension_numbers<[1], [0], [0], [1], [0, 0, 1, 1], [], []>} : vector<7x128xbf16>, vector<128x32xbf16>, vector<7x32xf32> -> vector<7x32xf32>
    %c0_62 = arith.constant 0 : index
    %c0_63 = arith.constant 0 : index
    %c0_64 = arith.constant 0 : index
    %141 = vector.load %arg14[%c0_62, %c0_63, %c0_64] : memref<1x1x32xf32, #tpu.memory_space<vmem>>, vector<1x1x32xf32>
    %142 = vector.shape_cast %141 : vector<1x1x32xf32> to vector<1x32xf32>
    %143 = vector.broadcast %142 : vector<1x32xf32> to vector<7x32xf32>
    %144 = arith.addf %140, %143 : vector<7x32xf32>
    %145 = arith.addf %89, %144 : vector<7x32xf32>
    %c0_65 = arith.constant 0 : index
    %c0_66 = arith.constant 0 : index
    %146 = vector.load %arg20[%c0_65, %c0_66] : memref<7x32xf32, #tpu.memory_space<vmem>>, vector<7x32xf32>
    tpu.vector_store %arg20[%c0_65, %c0_66], %145 {strides = array<i32>} : memref<7x32xf32, #tpu.memory_space<vmem>>, vector<7x32xf32>,
    %c1_i32 = arith.constant 1 : i32
    %147 = arith.cmpi eq, %arg1, %c1_i32 : i32
    %148 = arith.extui %147 : i1 to i32
    %c0_i32_67 = arith.constant 0 : i32
    %149 = arith.cmpi ne, %148, %c0_i32_67 : i32
    scf.if %149 {
      %150 = vector.extract_strided_slice %66 {offsets = [0, 0, 0], sizes = [2, 1, 7], strides = [1, 1, 1]} : vector<2x7x7xf32> to vector<2x1x7xf32>
      %151 = vector.shape_cast %150 : vector<2x1x7xf32> to vector<2x7xf32>
      %152 = vector.extract_strided_slice %68 {offsets = [0, 0, 0], sizes = [2, 1, 1], strides = [1, 1, 1]} : vector<2x7x1xf32> to vector<2x1x1xf32>
      %153 = vector.shape_cast %152 : vector<2x1x1xf32> to vector<2x1xf32>
      %154 = vector.broadcast %153 : vector<2x1xf32> to vector<2x7xf32>
      %155 = arith.divf %151, %154 : vector<2x7xf32>
      %cst_68 = arith.constant dense<0.000000e+00> : vector<7xf32>
      %156 = vector.multi_reduction <add>, %155, %cst_68 [0] : vector<2x7xf32> to vector<7xf32>
      %157 = vector.shape_cast %156 : vector<7xf32> to vector<1x7xf32>
      %cst_69 = arith.constant 2.000000e+00 : f32
      %158 = vector.broadcast %cst_69 : f32 to vector<1x7xf32>
      %159 = arith.divf %157, %158 : vector<1x7xf32>
      %c0_70 = arith.constant 0 : index
      %c0_71 = arith.constant 0 : index
      %c0_72 = arith.constant 0 : index
      %160 = vector.load %arg18[%c0_70, %c0_71, %c0_72] : memref<1x1x7xf32, #tpu.memory_space<vmem>>, vector<1x1x7xf32>
      %161 = vector.shape_cast %160 : vector<1x1x7xf32> to vector<1x7xf32>
      %162 = vector.shape_cast %159 : vector<1x7xf32> to vector<1x1x7xf32>
      tpu.vector_store %arg18[%c0_70, %c0_71, %c0_72], %162 {strides = array<i32>} : memref<1x1x7xf32, #tpu.memory_space<vmem>>, vector<1x1x7xf32>,
      %163 = vector.extract_strided_slice %145 {offsets = [0, 0], sizes = [1, 32], strides = [1, 1]} : vector<7x32xf32> to vector<1x32xf32>
      %164 = vector.extract_strided_slice %145 {offsets = [1, 0], sizes = [6, 32], strides = [1, 1]} : vector<7x32xf32> to vector<6x32xf32>
      %cst_73 = arith.constant dense<0.000000e+00> : vector<32xf32>
      %165 = vector.multi_reduction <add>, %164, %cst_73 [0] : vector<6x32xf32> to vector<32xf32>
      %166 = vector.shape_cast %165 : vector<32xf32> to vector<1x32xf32>
      %cst_74 = arith.constant 6.000000e+00 : f32
      %167 = vector.broadcast %cst_74 : f32 to vector<1x32xf32>
      %168 = arith.divf %166, %167 : vector<1x32xf32>
      %169 = tpu.concatenate %163, %168 in 1 : vector<1x32xf32>, vector<1x32xf32> -> vector<1x64xf32>
      %c0_75 = arith.constant 0 : index
      %c0_76 = arith.constant 0 : index
      %c0_77 = arith.constant 0 : index
      %170 = vector.load %arg17[%c0_75, %c0_76, %c0_77] : memref<1x1x64xf32, #tpu.memory_space<vmem>>, vector<1x1x64xf32>
      %171 = vector.shape_cast %170 : vector<1x1x64xf32> to vector<1x64xf32>
      %172 = vector.shape_cast %169 : vector<1x64xf32> to vector<1x1x64xf32>
      tpu.vector_store %arg17[%c0_75, %c0_76, %c0_77], %172 {strides = array<i32>} : memref<1x1x64xf32, #tpu.memory_space<vmem>>, vector<1x1x64xf32>,
      %c0_78 = arith.constant 0 : index
      %c0_79 = arith.constant 0 : index
      %173 = vector.load %arg15[%c0_78, %c0_79] : memref<1x32xf32, #tpu.memory_space<vmem>>, vector<1x32xf32>
      %cst_80 = arith.constant dense<0.000000e+00> : vector<1x6xf32>
      %174 = tpu.matmul %173, %164, %cst_80 {dimension_numbers = #tpu.dot_dimension_numbers<[1], [1], [0], [0], [0, 0, 1, 0], [], []>} : vector<1x32xf32>, vector<6x32xf32>, vector<1x6xf32> -> vector<1x6xf32>
      %c0_81 = arith.constant 0 : index
      %175 = memref.load %arg16[%c0_81] : memref<1xf32, #tpu.memory_space<smem>>
      %176 = vector.broadcast %175 : f32 to vector<1x6xf32>
      %177 = arith.addf %174, %176 : vector<1x6xf32>
      %cst_82 = arith.constant 0.000000e+00 : f32
      %178 = vector.broadcast %cst_82 : f32 to vector<1x6xf32>
      %179 = arith.maximumf %177, %178 : vector<1x6xf32>
      %c0_83 = arith.constant 0 : index
      %c0_84 = arith.constant 0 : index
      %c0_85 = arith.constant 0 : index
      %180 = vector.load %arg19[%c0_83, %c0_84, %c0_85] : memref<1x1x6xf32, #tpu.memory_space<vmem>>, vector<1x1x6xf32>
      %181 = vector.shape_cast %180 : vector<1x1x6xf32> to vector<1x6xf32>
      %182 = vector.shape_cast %179 : vector<1x6xf32> to vector<1x1x6xf32>
      tpu.vector_store %arg19[%c0_83, %c0_84, %c0_85], %182 {strides = array<i32>} : memref<1x1x6xf32, #tpu.memory_space<vmem>>, vector<1x1x6xf32>,
    } else {
    }
    return
  }
  func.func @transform_0(%arg0: i32, %arg1: i32) -> (i32, i32, i32) {
    %c0_i32 = arith.constant 0 : i32
    %c0_i32_0 = arith.constant 0 : i32
    %c0_i32_1 = arith.constant 0 : i32
    return %arg0, %c0_i32, %c0_i32_0 : i32, i32, i32
  }
  func.func @transform_1(%arg0: i32, %arg1: i32) -> (i32, i32, i32) {
    %c0_i32 = arith.constant 0 : i32
    %c0_i32_0 = arith.constant 0 : i32
    %c0_i32_1 = arith.constant 0 : i32
    return %arg1, %c0_i32, %c0_i32_0 : i32, i32, i32
  }
  func.func @transform_2(%arg0: i32, %arg1: i32) -> (i32, i32, i32) {
    %c0_i32 = arith.constant 0 : i32
    %c0_i32_0 = arith.constant 0 : i32
    %c0_i32_1 = arith.constant 0 : i32
    return %arg1, %c0_i32, %c0_i32_0 : i32, i32, i32
  }
  func.func @transform_3(%arg0: i32, %arg1: i32) -> (i32, i32, i32) {
    %c0_i32 = arith.constant 0 : i32
    %c0_i32_0 = arith.constant 0 : i32
    %c0_i32_1 = arith.constant 0 : i32
    return %arg1, %c0_i32, %c0_i32_0 : i32, i32, i32
  }
  func.func @transform_4(%arg0: i32, %arg1: i32) -> (i32, i32, i32) {
    %c0_i32 = arith.constant 0 : i32
    %c0_i32_0 = arith.constant 0 : i32
    %c0_i32_1 = arith.constant 0 : i32
    return %arg1, %c0_i32, %c0_i32_0 : i32, i32, i32
  }
  func.func @transform_5(%arg0: i32, %arg1: i32) -> (i32, i32, i32) {
    %c0_i32 = arith.constant 0 : i32
    %c0_i32_0 = arith.constant 0 : i32
    %c0_i32_1 = arith.constant 0 : i32
    return %arg1, %c0_i32, %c0_i32_0 : i32, i32, i32
  }
  func.func @transform_6(%arg0: i32, %arg1: i32) -> (i32, i32, i32) {
    %c0_i32 = arith.constant 0 : i32
    %c0_i32_0 = arith.constant 0 : i32
    %c0_i32_1 = arith.constant 0 : i32
    return %arg1, %c0_i32, %c0_i32_0 : i32, i32, i32
  }
  func.func @transform_7(%arg0: i32, %arg1: i32) -> (i32, i32, i32) {
    %c0_i32 = arith.constant 0 : i32
    %c0_i32_0 = arith.constant 0 : i32
    %c0_i32_1 = arith.constant 0 : i32
    return %arg1, %c0_i32, %c0_i32_0 : i32, i32, i32
  }
  func.func @transform_8(%arg0: i32, %arg1: i32) -> (i32, i32, i32) {
    %c0_i32 = arith.constant 0 : i32
    %c0_i32_0 = arith.constant 0 : i32
    %c0_i32_1 = arith.constant 0 : i32
    return %arg1, %c0_i32, %c0_i32_0 : i32, i32, i32
  }
  func.func @transform_9(%arg0: i32, %arg1: i32) -> (i32, i32, i32) {
    %c0_i32 = arith.constant 0 : i32
    %c0_i32_0 = arith.constant 0 : i32
    %c0_i32_1 = arith.constant 0 : i32
    return %arg1, %c0_i32, %c0_i32_0 : i32, i32, i32
  }
  func.func @transform_10(%arg0: i32, %arg1: i32) -> (i32, i32, i32) {
    %c0_i32 = arith.constant 0 : i32
    %c0_i32_0 = arith.constant 0 : i32
    %c0_i32_1 = arith.constant 0 : i32
    return %arg1, %c0_i32, %c0_i32_0 : i32, i32, i32
  }
  func.func @transform_11(%arg0: i32, %arg1: i32) -> (i32, i32, i32) {
    %c0_i32 = arith.constant 0 : i32
    %c0_i32_0 = arith.constant 0 : i32
    %c0_i32_1 = arith.constant 0 : i32
    return %arg1, %c0_i32, %c0_i32_0 : i32, i32, i32
  }
  func.func @transform_12(%arg0: i32, %arg1: i32) -> (i32, i32, i32) {
    %c0_i32 = arith.constant 0 : i32
    %c0_i32_0 = arith.constant 0 : i32
    %c0_i32_1 = arith.constant 0 : i32
    return %arg1, %c0_i32, %c0_i32_0 : i32, i32, i32
  }
  func.func @transform_13(%arg0: i32, %arg1: i32) -> (i32, i32) {
    %c0_i32 = arith.constant 0 : i32
    %c0_i32_0 = arith.constant 0 : i32
    %c0_i32_1 = arith.constant 0 : i32
    return %c0_i32, %c0_i32_0 : i32, i32
  }
  func.func @transform_14(%arg0: i32, %arg1: i32) -> i32 {
    %c0_i32 = arith.constant 0 : i32
    %c0_i32_0 = arith.constant 0 : i32
    return %c0_i32 : i32
  }
  func.func @transform_15(%arg0: i32, %arg1: i32) -> (i32, i32, i32) {
    %c0_i32 = arith.constant 0 : i32
    %c0_i32_0 = arith.constant 0 : i32
    %c0_i32_1 = arith.constant 0 : i32
    return %arg0, %c0_i32, %c0_i32_0 : i32, i32, i32
  }
  func.func @transform_16(%arg0: i32, %arg1: i32) -> (i32, i32, i32) {
    %c0_i32 = arith.constant 0 : i32
    %c0_i32_0 = arith.constant 0 : i32
    %c0_i32_1 = arith.constant 0 : i32
    return %arg0, %c0_i32, %c0_i32_0 : i32, i32, i32
  }
  func.func @transform_17(%arg0: i32, %arg1: i32) -> (i32, i32, i32) {
    %c0_i32 = arith.constant 0 : i32
    %c0_i32_0 = arith.constant 0 : i32
    %c0_i32_1 = arith.constant 0 : i32
    return %arg0, %c0_i32, %c0_i32_0 : i32, i32, i32
  }
}

module attributes {stable_mosaic.version = 11 : i64} {
  func.func @_resize_norm_kernel(%arg0: i32, %arg1: i32, %arg2: memref<1x1x2x3xf32, #tpu.memory_space<vmem>>, %arg3: memref<28x2xf32, #tpu.memory_space<vmem>>, %arg4: memref<3x42xf32, #tpu.memory_space<vmem>>, %arg5: memref<1xf32, #tpu.memory_space<smem>>, %arg6: memref<1xf32, #tpu.memory_space<smem>>, %arg7: memref<1x1x28x42xf32, #tpu.memory_space<vmem>>) attributes {dimension_semantics = [#tpu.dimension_semantics<parallel>, #tpu.dimension_semantics<parallel>], iteration_bounds = array<i64: 2, 1>, scalar_prefetch = 0 : i64, scratch_operands = 0 : i64, tpu.core_type = #tpu.core_type<tc>, window_params = [{transform_indices = @transform_0, window_bounds = array<i64: 1, 1, 2, 3>}, {pipeline_mode = #tpu.pipeline_mode<synchronous>, transform_indices = @transform_1, window_bounds = array<i64: 28, 2>}, {pipeline_mode = #tpu.pipeline_mode<synchronous>, transform_indices = @transform_2, window_bounds = array<i64: 3, 42>}, {transform_indices = @transform_3, window_bounds = array<i64: 1>}, {transform_indices = @transform_4, window_bounds = array<i64: 1>}, {transform_indices = @transform_5, window_bounds = array<i64: 1, 1, 28, 42>}]} {
    %c0 = arith.constant 0 : index
    %c0_0 = arith.constant 0 : index
    %c0_1 = arith.constant 0 : index
    %c0_2 = arith.constant 0 : index
    %0 = vector.load %arg2[%c0, %c0_0, %c0_1, %c0_2] : memref<1x1x2x3xf32, #tpu.memory_space<vmem>>, vector<1x1x2x3xf32>
    %1 = vector.shape_cast %0 : vector<1x1x2x3xf32> to vector<2x3xf32>
    %c0_3 = arith.constant 0 : index
    %c0_4 = arith.constant 0 : index
    %2 = vector.load %arg3[%c0_3, %c0_4] : memref<28x2xf32, #tpu.memory_space<vmem>>, vector<28x2xf32>
    %c0_5 = arith.constant 0 : index
    %c0_6 = arith.constant 0 : index
    %3 = vector.load %arg4[%c0_5, %c0_6] : memref<3x42xf32, #tpu.memory_space<vmem>>, vector<3x42xf32>
    %cst = arith.constant dense<0.000000e+00> : vector<2x42xf32>
    %4 = tpu.matmul %1, %3, %cst {dimension_numbers = #tpu.dot_dimension_numbers<[1], [0], [0], [1], [0, 0, 1, 1], [], []>} : vector<2x3xf32>, vector<3x42xf32>, vector<2x42xf32> -> vector<2x42xf32>
    %cst_7 = arith.constant dense<0.000000e+00> : vector<28x42xf32>
    %5 = tpu.matmul %2, %4, %cst_7 {dimension_numbers = #tpu.dot_dimension_numbers<[1], [0], [0], [1], [0, 0, 1, 1], [], []>} : vector<28x2xf32>, vector<2x42xf32>, vector<28x42xf32> -> vector<28x42xf32>
    %6 = arith.index_cast %arg1 : i32 to index
    %7 = memref.load %arg5[%6] : memref<1xf32, #tpu.memory_space<smem>>
    %8 = vector.broadcast %7 : f32 to vector<28x42xf32>
    %9 = arith.mulf %5, %8 : vector<28x42xf32>
    %10 = arith.index_cast %arg1 : i32 to index
    %11 = memref.load %arg6[%10] : memref<1xf32, #tpu.memory_space<smem>>
    %12 = vector.broadcast %11 : f32 to vector<28x42xf32>
    %13 = arith.addf %9, %12 : vector<28x42xf32>
    %c0_8 = arith.constant 0 : index
    %c0_9 = arith.constant 0 : index
    %c0_10 = arith.constant 0 : index
    %c0_11 = arith.constant 0 : index
    %14 = vector.load %arg7[%c0_8, %c0_9, %c0_10, %c0_11] : memref<1x1x28x42xf32, #tpu.memory_space<vmem>>, vector<1x1x28x42xf32>
    %15 = vector.shape_cast %14 : vector<1x1x28x42xf32> to vector<28x42xf32>
    %16 = vector.shape_cast %13 : vector<28x42xf32> to vector<1x1x28x42xf32>
    tpu.vector_store %arg7[%c0_8, %c0_9, %c0_10, %c0_11], %16 {strides = array<i32>} : memref<1x1x28x42xf32, #tpu.memory_space<vmem>>, vector<1x1x28x42xf32>,
    return
  }
  func.func @transform_0(%arg0: i32, %arg1: i32) -> (i32, i32, i32, i32) {
    %c0_i32 = arith.constant 0 : i32
    %c0_i32_0 = arith.constant 0 : i32
    %c0_i32_1 = arith.constant 0 : i32
    return %arg0, %arg1, %c0_i32, %c0_i32_0 : i32, i32, i32, i32
  }
  func.func @transform_1(%arg0: i32, %arg1: i32) -> (i32, i32) {
    %c0_i32 = arith.constant 0 : i32
    %c0_i32_0 = arith.constant 0 : i32
    %c0_i32_1 = arith.constant 0 : i32
    return %c0_i32, %c0_i32_0 : i32, i32
  }
  func.func @transform_2(%arg0: i32, %arg1: i32) -> (i32, i32) {
    %c0_i32 = arith.constant 0 : i32
    %c0_i32_0 = arith.constant 0 : i32
    %c0_i32_1 = arith.constant 0 : i32
    return %c0_i32, %c0_i32_0 : i32, i32
  }
  func.func @transform_3(%arg0: i32, %arg1: i32) -> i32 {
    %c0_i32 = arith.constant 0 : i32
    %c0_i32_0 = arith.constant 0 : i32
    return %c0_i32 : i32
  }
  func.func @transform_4(%arg0: i32, %arg1: i32) -> i32 {
    %c0_i32 = arith.constant 0 : i32
    %c0_i32_0 = arith.constant 0 : i32
    return %c0_i32 : i32
  }
  func.func @transform_5(%arg0: i32, %arg1: i32) -> (i32, i32, i32, i32) {
    %c0_i32 = arith.constant 0 : i32
    %c0_i32_0 = arith.constant 0 : i32
    %c0_i32_1 = arith.constant 0 : i32
    return %arg0, %arg1, %c0_i32, %c0_i32_0 : i32, i32, i32, i32
  }
}

</mosaic_0001>

<bundles_post_ra>
// kernel: image_depth_anything_encoder.4
= control target key start
LH: loop header
LB: loop body
LE: loop exit
PB: predicated region body
PF: predicated region fallthrough
CT: control target
= control target key end

     0   :  { %s1071_s0 = inlined_call_operand.hbm [shape: f32[2,3,16,16], index: 0, kind: input, shape index: {}]   ;;  %s1072_s1 = inlined_call_operand.hbm [shape: f32[28,16], index: 1, kind: input, shape index: {}]   ;;  %s1073_s2 = inlined_call_operand.vmem [shape: f32[16,42], index: 2, kind: input, shape index: {}]   ;;  %s1074_s3 = inlined_call_operand.vmem [shape: f32[3], index: 3, kind: input, shape index: {}]   ;;  %s1075_s4 = inlined_call_operand.vmem [shape: f32[3], index: 4, kind: input, shape index: {}]   ;;  %s1076_s5 = inlined_call_operand.vmem [shape: bf16[2,3,28,42], index: 5, kind: output, shape index: {}]  }
   0x1   :  { %1082 = sst [smem:[#allocation17_spill]] %s1072_s1 }
   0x2   :  { %1083 = sst [smem:[#allocation18_spill]] %s1074_s3 }
   0x3   :  { %1084 = sst [smem:[#allocation19_spill]] %s1075_s4 }
   0x4   :  { %10 = vsyncpa [#allocation3], 0 }
   0x5   :  { %12 = vsyncpa [#allocation3 + $0x1], 0 }
   0x6   :  { %13 = vsyncpa [#allocation6], 0 }
   0x7   :  { %14 = vsyncpa [#allocation4], 0 }
   0x8   :  { %15 = vsyncpa [#allocation9], 0  ;;  %s905_s18 = smov 0   ;;  %s907_s19 = smov 0  }
   0x9   :  { %s909_s20 = smov 0   ;;  %s911_s21 = smov 0  }
   0xa   :  { %s913_s22 = smov 0   ;;  %s915_s23 = smov 0  }
   0xb   :  { %s917_s24 = smov 0   ;;  %s919_s25 = smov 0  }
   0xc LB: > { %1085 = sst [smem:[#allocation14_spill]] %s868_s25  ;;  %s563_s26 = sadd.s32 4294967295, %s868_s25   ;;  %s868_s25 = sphi %s919_s25, %s21_s25   ;;  %s864_s24 = sphi %s917_s24, %s1105_s24   ;;  %s860_s23 = sphi %s915_s23, %s1104_s23   ;;  %s856_s22 = sphi %s913_s22, %s1103_s22   ;;  %s852_s21 = sphi %s911_s21, %s1102_s21   ;;  %s848_s20 = sphi %s909_s20, %s1101_s20   ;;  %s844_s19 = sphi %s907_s19, %s1100_s19   ;;  %s840_s18 = sphi %s905_s18, %s1099_s18  }
   0xd   : > { %p55_p0 = scmp.ne.s32.totalorder %s844_s19, %s840_s18  ;;  %p945_p1 = scmp.eq.s32.totalorder %s563_s26, 0 }
   0xe   : > { %p565_p2 = scmp.ge.s32.totalorder %s868_s25, 1  ;;  %p178_p3 = scmp.lt.s32.totalorder %s868_s25, 7 }
   0xf   : > { %p953_p4 = por %p945_p1, %p55_p0  ;;  %s1088_s1 = sld [smem:[#allocation17_spill]] }
  0x10   : > { %p960_p5 = pnand %p565_p2, %p178_p3  ;;  %s870_s8 = smov [#allocation5]  }
  0x11   : > { %s191_s9 = sshll.u32 %s870_s8, 4  ;;  %s1090_s3 = sld [smem:[#allocation18_spill]]  ;;  %s192_s9 = int_to_ptr.vmem [resolvable:$true] %s191_s9 }
  0x12   : > { %p610_p6 = pneg %p960_p5  ;;  %s1077_s13 = smov 128  }
  0x13   : > { %s1078_s14 = smov 8   ;;  %s873_s15 = smov [#allocation7]  }
  0x14   : > { %p611_p7 = pnand %p610_p6, %p945_p1  ;;  %s1091_s4 = sld [smem:[#allocation19_spill]] }
  0x15   : > { %s189_s6 = sshll.u32 %s1088_s1, 4  ;;  %s874_s26 = smov [#allocation8]   ;;  %s190_s6 = int_to_ptr.hbm [resolvable:$true] %s189_s6 }
  0x16   : > { %613 = dma.hbm_to_vmem [thread:$0]  (!%p611_p7), %s190_s6, 512, %s192_s9, [#allocation6], %s1077_s13, %s1077_s13, %s1078_s14  }
  0x17   : > { %s207_s12 = sshll.u32 %s1090_s3, 4  ;;  %s30_s29 = sadd.s32 1, %s860_s23  ;;  %s208_s12 = int_to_ptr.vmem [resolvable:$true] %s207_s12 }
  0x18   : > { %616 = dma.vmem_to_smem (!%p611_p7), %s208_s12, 16, %s873_s15, [#allocation4]  }
  0x19   : > { %p31_p8 = scmp.ge.s32.totalorder %s30_s29, 3  ;;  %s33_s30 = sadd.s32 1, %s864_s24 }
  0x1a   : > { %s217_s18 = sshll.u32 %s1091_s4, 4  ;;  %s42_s8 = sadd.s32 1, %s848_s20  ;;  %s218_s18 = int_to_ptr.vmem [resolvable:$true] %s217_s18 }
  0x1b   : > { %619 = dma.vmem_to_smem (!%p611_p7), %s218_s18, 16, %s874_s26, [#allocation9]  }
  0x1c   : > { %s1107_s29 = smov (%p31_p8, %s30_s29), 0  ;;  %s1109_s30 = smov (!%p31_p8, %s33_s30), %s864_s24 }
  0x1d   : > { %1092 = sst [smem:[#allocation15_spill]] %s1107_s29  ;;  %p49_p9 = scmp.ne.s32.totalorder %s848_s20, %s844_s19 }
  0x1e   : > { %p50_p10 = scmp.eq.s32.totalorder %s868_s25, 0  ;;  %p35_p11 = scmp.ge.s32.totalorder %s1109_s30, 2 }
  0x1f   : > { %s38_s6 = ssub.s32 %s860_s23, %s1107_s29  ;;  %p627_p12 = scmp.lt.s32.totalorder %s868_s25, 6 }
  0x20   : > { %s228_s9 = sand.u32 1, %s848_s20   ;;  %s1111_s30 = smov (%p35_p11, %s1109_s30), 0 }
  0x21   : > { %1093 = sst [smem:[#allocation16_spill]] %s1111_s30  ;;  %p51_p13 = por %p50_p10, %p49_p9 }
  0x22   : > { %s570_s10 = sshll.u32 %s228_s9, 4  ;;  %s37_s11 = ssub.s32 %s864_s24, %s1111_s30 }
  0x23   : > { %s39_s12 = sor.u32 %s38_s6, %s37_s11  ;;  %s571_s15 = sshll.u32 %s860_s23, 1 }
  0x24   : > { %p40_p0 = scmp.eq.s32.totalorder %s39_s12, 0  ;;  %s594_s16 = smul.u32 6, %s864_s24 }
  0x25   : > { %s232_s17 = scalar_lea.vmem [#allocation2], %s570_s10  ;;  %p621_p2 = pnand %p627_p12, %p51_p13 }
  0x26   : > { %s242_s18 = sshll.u32 %s232_s17, 4  ;;  %s237_s13 = sadd.s32 %s594_s16, %s571_s15  ;;  %s243_s18 = int_to_ptr.vmem [resolvable:$true] %s242_s18 }
  0x27   : > { %s997_s26 = scalar_select %p40_p0, %s848_s20, %s42_s8  }
  0x28   : > { %s572_s14 = sshll.u32 %s237_s13, 3  ;;  %s229_s25 = scalar_lea.sflag [#allocation3], %s228_s9 }
  0x29   : > { %s239_s4 = scalar_lea.hbm %s1071_s0, %s572_s14  ;;  %s1094_s30 = smov 8  }
  0x2a   : > { %s240_s29 = sshll.u32 %s239_s4, 4  ;;  %s1095_s6 = smov 128   ;;  %s241_s29 = int_to_ptr.hbm [resolvable:$true] %s240_s29 }
  0x2b   : > { %623 = dma.hbm_to_vmem [thread:$0]  (!%p621_p2), %s241_s29, 256, %s243_s18, %s229_s25, %s1095_s6, %s1095_s6, %s1094_s30  }
  0x2c   : > { %254 = sbr.rel (%p960_p5) target bundleno = 341 (0x155), region = 40  ;;  %s256_s8 = sand.u32 (!%p960_p5), 1, %s844_s19  }
  0x2d   : > { %s574_s10 = sshll.u32 (!%p960_p5), %s256_s8, 4  ;;  %s257_s13 = scalar_lea.sflag (!%p960_p5), [#allocation3], %s256_s8 }
  0x2e   : > { %s260_s11 = scalar_lea.vmem (!%p960_p5), [#allocation2], %s574_s10 }
  0x31   : > { %823 = dma.done.wait (%p953_p4), %s257_s13, 256  }
  0x32   : > { %825 = vsyncadd (%p953_p4), %s257_s13, 4294967040 }
  0x33   : > { %827 = dma.done.wait (%p945_p1), [#allocation6], 512  }
  0x34   : > { %829 = vsyncadd (%p945_p1), [#allocation6], 4294966784 }
  0x35   : > { %831 = dma.done.wait (%p945_p1), [#allocation4], 16  }
  0x36   : > { %833 = vsyncadd (%p945_p1), [#allocation4], 4294967280 }
  0x37   : > { %835 = dma.done.wait (%p945_p1), [#allocation9], 16  }
  0x38   : > { %837 = vsyncadd (%p945_p1), [#allocation9], 4294967280 }
  0x39   : > { %281 = sfence }
  0x3a   : > { %v318_v0 = vld [vmem:[%s260_s11 + $0x8] sm:$0xff]  ;;  %v317_v1 = vld [vmem:[%s260_s11] sm:$0xff]  ;;  %vm323_vm0 = vcmask 130048   ;;  %p308_p1 = scmp.lt.s32.totalorder %s856_s22, 1  ;;  %p310_p3 = scmp.lt.s32.totalorder %s852_s21, 2  ;;  %vm424_vm1 = vcmask 338944  }
  0x3b   : > { %590 = vmatpush.msra.mxu2 %v318_v0  ;;  %v321_v2 = vld [vmem:[#allocation5 + $0x10] sm:$0xff]  ;;  %350 = vmatpush.msra.mxu0 %v318_v0  ;;  %v319_v3 = vld [vmem:[#allocation5] sm:$0xff]  ;;  %v366_v4 = vld [vmem:[%s1073_s2 + $0x8] sm:$0xff]  ;;  %s408_s27 = sld [smem:[#allocation7 + %s852_s21]]  ;;  %vm428_vm2 = vcmask 336896  }
  0x3c   : > { %592 = vmatpush.msra.mxu3 %v366_v4  ;;  %393 = vmatpush.msra.mxu1 %v366_v4  ;;  %v322_v5 = vld [vmem:[#allocation5 + $0x18] sm:$0xf]  ;;  %v320_v6 = vld [vmem:[#allocation5 + $0x8] sm:$0xff]  ;;  %v365_v7 = vld [vmem:[%s1073_s2] sm:$0xff]  ;;  %s1113_s22 = smov (!%p308_p1, %s856_s22), 1  ;;  %s414_s7 = sld [smem:[#allocation8 + %s852_s21]] }
  0x3d   : > { %591 = vmatpush.msra.mxu2 %v317_v1  ;;  %351 = vmatpush.msra.mxu0 %v317_v1  ;;  %s311_s28 = scalar_select %p310_p3, %s852_s21, 2 }
  0x3e   : > { %582 = vmatmul.msk.f32.vlgmr.msra.gmra.mxu2 %vm323_vm0, %v321_v2  ;;  %580 = vmatmul.msk.f32.vlgmr.msra.gmra.mxu0 %vm323_vm0, %v319_v3  ;;  %s595_s14 = smul.u32 12, %s1113_s22 }
  0x3f   : > { %593 = vmatpush.msra.mxu3 %v365_v7  ;;  %394 = vmatpush.msra.mxu1 %v365_v7  ;;  %s578_s29 = sshll.u32 %s311_s28, 2 }
  0x40   : > { %s314_s30 = sadd.s32 %s595_s14, %s578_s29 }
  0x41   : > { %v409_v12 = vstv %s408_s27  ;;  %s579_s9 = sshll.u32 %s314_s30, 2 }
  0x42   : > { %v415_v14 = vstv %s414_s7  ;;  %s316_s16 = scalar_lea.vmem %s1076_s5, %s579_s9 }
  0x46   : > { %583 = vmatmul.msk.f32.gmra.mxu2 %vm323_vm0, %v322_v5  ;;  %581 = vmatmul.msk.f32.gmra.mxu0 %vm323_vm0, %v320_v6 }
  0xbb   : > { %v353_v8 = vpop.f32.mrf.mxu0 }
  0xbc   : > { %584 = vmatmul.msk.f32.vlgmr.msra.gmra.mxu1 %vm323_vm0, %v353_v8 }
  0xc1   : > { %v359_v9 = vpop.f32.mrf.mxu2 }
  0xc2   : > { %586 = vmatmul.msk.f32.vlgmr.msra.gmra.mxu3 %vm323_vm0, %v359_v9 }
  0xc3   : > { %v356_v10 = vpop.f32.mrf.mxu0 }
  0xc4   : > { %585 = vmatmul.msk.f32.gmra.mxu1 %vm323_vm0, %v356_v10 }
  0xc9   : > { %v362_v11 = vpop.f32.mrf.mxu2 }
  0xca   : > { %587 = vmatmul.msk.f32.gmra.mxu3 %vm323_vm0, %v362_v11 }
 0x139   : > { %v396_v13 = vpop.f32.mrf.mxu1 }
 0x13a   : > { %v410_v15 = vmul.f32 %v409_v12, %v396_v13 }
 0x13c   : > { %v416_v16 = vadd.f32 %v415_v14, %v410_v15 }
 0x13e   : > { %v420_v17 = vpack.c.bf16 %v416_v16, %v416_v16 }
 0x140   : > { %425 = vst.msk [vmem:[%s316_s16] sm:$0xf] %vm424_vm1, %v420_v17 }
 0x141   : > { %v399_v18 = vpop.f32.mrf.mxu1 }
 0x142   : > { %v411_v19 = vmul.f32 %v409_v12, %v399_v18 }
 0x144   : > { %v417_v20 = vadd.f32 %v415_v14, %v411_v19 }
 0x145   : > { %v402_v21 = vpop.f32.mrf.mxu3 }
 0x146   : > { %v412_v22 = vmul.f32 %v409_v12, %v402_v21  ;;  %v421_v23 = vpack.c.bf16 %v417_v20, %v417_v20 }
 0x148   : > { %v418_v24 = vadd.f32 %v415_v14, %v412_v22  ;;  %426 = vst.msk [vmem:[%s316_s16 + $0x4] sm:$0xf] %vm424_vm1, %v421_v23 }
 0x14a   : > { %v422_v25 = vpack.c.bf16 %v418_v24, %v418_v24 }
 0x14c   : > { %427 = vst.msk [vmem:[%s316_s16 + $0x8] sm:$0xf] %vm424_vm1, %v422_v25 }
 0x14d   : > { %v405_v26 = vpop.f32.mrf.mxu3 }
 0x14e   : > { %v413_v27 = vmul.f32 %v409_v12, %v405_v26 }
 0x150   : > { %v419_v28 = vadd.f32 %v415_v14, %v413_v27 }
 0x152   : > { %v423_v29 = vpack.c.bf16 %v419_v28, %v419_v28 }
 0x154   : > { %429 = vst.msk [vmem:[%s316_s16 + $0xc] sm:$0x3] %vm428_vm2, %v423_v29 }
 0x155 PF: > { %s1096_s21 = sld [smem:[#allocation14_spill]]  ;;  %s1099_s18 = smov %s844_s19 }
 0x156   : > { %s1097_s17 = sld [smem:[#allocation15_spill]]  ;;  %s1100_s19 = smov %s848_s20 }
 0x157   : > { %s1098_s6 = sld [smem:[#allocation16_spill]]  ;;  %s1101_s20 = smov %s997_s26 }
 0x158   : > { %s1103_s22 = smov %s864_s24 }
 0x15b   : > { %s21_s25 = sadd.s32 1, %s1096_s21   ;;  %s1102_s21 = smov %s860_s23 }
 0x15c   : > { %p18_p4 = scmp.ge.s32.totalorder %s21_s25, 8   ;;  %s1104_s23 = smov %s1097_s17 }
 0x15d   : > { %s1105_s24 = smov %s1098_s6 }
 0x15e   :  { %20 = sbr.rel (!%p18_p4) target bundleno = 12 (0xc), region = 93 }
 0x163   :  { %459 = vsyncpa [#allocation3], 1 }
 0x164   :  { %461 = vsyncpa [#allocation3 + $0x1], 1 }
 0x165   :  { %462 = vsyncpa [#allocation6], 1 }
 0x166   :  { %463 = vsyncpa [#allocation4], 1 }
 0x167   :  { %465 = vsyncpa [#allocation4 + $0x1], 1 }
 0x168   :  { %466 = vsyncpa [#allocation9], 1 }

// kernel: image_depth_anything_encoder.5
= control target key start
LH: loop header
LB: loop body
LE: loop exit
PB: predicated region body
PF: predicated region fallthrough
CT: control target
= control target key end

     0   :  { %vm349_vm0 = vcmask 1045504   ;;  %vm345_vm1 = vcmask 621568   ;;  %vm423_vm2 = vcmask 261120   ;;  %vm425_vm3 = vcmask 257024   ;;  %s816_s1 = inlined_call_operand.vmem [shape: bf16[588,32], index: 1, kind: input, shape index: {}]   ;;  %s817_s2 = inlined_call_operand.vmem [shape: f32[1,32], index: 2, kind: input, shape index: {}]   ;;  %s818_s0 = inlined_call_operand.vmem [shape: bf16[12,588], index: 0, kind: input, shape index: {}]   ;;  %s819_s3 = inlined_call_operand.vmem [shape: f32[12,32], index: 3, kind: output, shape index: {}]  }
   0x1   :  { %v612_v0 = vld [vmem:[%s816_s1 + $0x38] sm:$0xff]  ;;  %v611_v4 = vld [vmem:[%s816_s1 + $0x30] sm:$0xff]  ;;  %v610_v8 = vld [vmem:[%s816_s1 + $0x28] sm:$0xff] }
   0x2   :  { %v628_v1 = vld [vmem:[%s816_s1 + $0xb8] sm:$0xff]  ;;  %353 = vmatpush.bf16.msra.mxu0 %v612_v0  ;;  %v627_v5 = vld [vmem:[%s816_s1 + $0xb0] sm:$0xff]  ;;  %v626_v9 = vld [vmem:[%s816_s1 + $0xa8] sm:$0xff] }
   0x3   :  { %v636_v2 = vld [vmem:[%s816_s1 + $0xf8] sm:$0xff]  ;;  %381 = vmatpush.bf16.msra.mxu2 %v628_v1  ;;  %v635_v6 = vld [vmem:[%s816_s1 + $0xf0] sm:$0xff]  ;;  %v634_v10 = vld [vmem:[%s816_s1 + $0xe8] sm:$0xff] }
   0x4   :  { %v620_v3 = vld [vmem:[%s816_s1 + $0x78] sm:$0xff]  ;;  %395 = vmatpush.bf16.msra.mxu3 %v636_v2  ;;  %v619_v7 = vld [vmem:[%s816_s1 + $0x70] sm:$0xff]  ;;  %v618_v11 = vld [vmem:[%s816_s1 + $0x68] sm:$0xff] }
   0x5   :  { %367 = vmatpush.bf16.msra.mxu1 %v620_v3  ;;  %v609_v12 = vld [vmem:[%s816_s1 + $0x20] sm:$0xff]  ;;  %v608_v16 = vld [vmem:[%s816_s1 + $0x18] sm:$0xff]  ;;  %v607_v20 = vld [vmem:[%s816_s1 + $0x10] sm:$0xff] }
   0x6   :  { %354 = vmatpush.bf16.msra.mxu0 %v611_v4  ;;  %v625_v13 = vld [vmem:[%s816_s1 + $0xa0] sm:$0xff]  ;;  %v624_v17 = vld [vmem:[%s816_s1 + $0x98] sm:$0xff]  ;;  %v623_v21 = vld [vmem:[%s816_s1 + $0x90] sm:$0xff] }
   0x7   :  { %382 = vmatpush.bf16.msra.mxu2 %v627_v5  ;;  %v633_v14 = vld [vmem:[%s816_s1 + $0xe0] sm:$0xff]  ;;  %v632_v18 = vld [vmem:[%s816_s1 + $0xd8] sm:$0xff]  ;;  %v631_v22 = vld [vmem:[%s816_s1 + $0xd0] sm:$0xff] }
   0x8   :  { %396 = vmatpush.bf16.msra.mxu3 %v635_v6  ;;  %v617_v15 = vld [vmem:[%s816_s1 + $0x60] sm:$0xff]  ;;  %v616_v19 = vld [vmem:[%s816_s1 + $0x58] sm:$0xff]  ;;  %v615_v23 = vld [vmem:[%s816_s1 + $0x50] sm:$0xff] }
   0x9   :  { %368 = vmatpush.bf16.msra.mxu1 %v619_v7  ;;  %v597_v24 = vld [vmem:[%s816_s1 + $0x120] sm:$0xf]  ;;  %v641_v25 = vld [vmem:[%s816_s1 + $0x120] sm:$0x30]  ;;  %v606_v26 = vld [vmem:[%s816_s1 + $0x8] sm:$0xff] }
   0xa   :  { %355 = vmatpush.bf16.msra.mxu0 %v610_v8  ;;  %v622_v27 = vld [vmem:[%s816_s1 + $0x88] sm:$0xff]  ;;  %v598_v30 = vor.u32 %v641_v25, %v597_v24  ;;  %v605_v31 = vld [vmem:[%s816_s1] sm:$0xff]  ;;  %v602_v34 = vld [vmem:[%s818_s0 + $0x10] sm:$0x30] }
   0xb   :  { %383 = vmatpush.bf16.msra.mxu2 %v626_v9  ;;  %v630_v28 = vld [vmem:[%s816_s1 + $0xc8] sm:$0xff]  ;;  %v621_v32 = vld [vmem:[%s816_s1 + $0x80] sm:$0xff]  ;;  %v603_v36 = vld [vmem:[%s818_s0 + $0x18] sm:$0x30] }
   0xc   :  { %397 = vmatpush.bf16.msra.mxu3 %v634_v10  ;;  %v614_v29 = vld [vmem:[%s816_s1 + $0x48] sm:$0xff]  ;;  %v433_v33 = vld [vmem:[%s818_s0] sm:$0xf]  ;;  %v351_v40 = vsel %vm349_vm0, %v598_v30, 0  ;;  %v600_v42 = vld [vmem:[%s818_s0 + $0x4] sm:$0xf] }
   0xd   :  { %369 = vmatpush.bf16.msra.mxu1 %v618_v11  ;;  %v441_v35 = vld [vmem:[%s818_s0 + $0x8] sm:$0xf]  ;;  %v629_v37 = vld [vmem:[%s816_s1 + $0xc0] sm:$0xff]  ;;  %v601_v38 = vld [vmem:[%s818_s0 + $0xc] sm:$0xf]  ;;  %v434_v44 = vor.u32 %v602_v34, %v433_v33 }
   0xe   :  { %356 = vmatpush.bf16.msra.mxu0 %v609_v12  ;;  %v443_v39 = vld [vmem:[%s818_s0 + $0x1c] sm:$0x30]  ;;  %v435_v43 = vld [vmem:[%s818_s0 + $0x14] sm:$0x30]  ;;  %v442_v45 = vor.u32 %v603_v36, %v441_v35  ;;  %v639_v49 = vld [vmem:[%s816_s1 + $0x110] sm:$0xff] }
   0xf   :  { %384 = vmatpush.bf16.msra.mxu2 %v625_v13  ;;  %v613_v41 = vld [vmem:[%s816_s1 + $0x40] sm:$0xff]  ;;  %v446_v46 = vor.u32 %v601_v38, %v443_v39  ;;  %v438_v47 = vor.u32 %v600_v42, %v435_v43  ;;  %v640_v48 = vld [vmem:[%s816_s1 + $0x118] sm:$0xff]  ;;  %v638_v50 = vld [vmem:[%s816_s1 + $0x108] sm:$0xff] }
  0x10   :  { %398 = vmatpush.bf16.msra.mxu3 %v633_v14  ;;  %v637_v51 = vld [vmem:[%s816_s1 + $0x100] sm:$0xff]  ;;  %v449_v52 = vld [vmem:[%s818_s0 + $0x10] sm:$0xf] }
  0x11   :  { %370 = vmatpush.bf16.msra.mxu1 %v617_v15  ;;  %v604_v53 = vld [vmem:[%s818_s0 + $0x20] sm:$0x30]  ;;  %v642_v55 = vld [vmem:[%s817_s2] ss:$0 sm:$0xff] }
  0x12   :  { %357 = vmatpush.bf16.msra.mxu0 %v608_v16  ;;  %v450_v54 = vor.u32 %v604_v53, %v449_v52 }
  0x13   :  { %385 = vmatpush.bf16.msra.mxu2 %v624_v17 }
  0x14   :  { %399 = vmatpush.bf16.msra.mxu3 %v632_v18 }
  0x15   :  { %371 = vmatpush.bf16.msra.mxu1 %v616_v19 }
  0x16   :  { %358 = vmatpush.bf16.msra.mxu0 %v607_v20 }
  0x17   :  { %386 = vmatpush.bf16.msra.mxu2 %v623_v21 }
  0x18   :  { %400 = vmatpush.bf16.msra.mxu3 %v631_v22 }
  0x19   :  { %372 = vmatpush.bf16.msra.mxu1 %v615_v23 }
  0x1a   :  { %359 = vmatpush.bf16.msra.mxu0 %v606_v26 }
  0x1b   :  { %387 = vmatpush.bf16.msra.mxu2 %v622_v27 }
  0x1c   :  { %401 = vmatpush.bf16.msra.mxu3 %v630_v28 }
  0x1d   :  { %373 = vmatpush.bf16.msra.mxu1 %v614_v29 }
  0x1e   :  { %360 = vmatpush.bf16.msra.mxu0 %v605_v31 }
  0x1f   :  { %388 = vmatpush.bf16.msra.mxu2 %v621_v32 }
  0x20   :  { %402 = vmatpush.bf16.msra.mxu3 %v629_v37 }
  0x21   :  { %374 = vmatpush.bf16.msra.mxu1 %v613_v41  ;;  %361 = vmatmul.bf16.vlgmr.msra.gmra.mxu0 %v434_v44 }
  0x22   :  { %412 = vmatpush.bf16.msrb.mxu0 %v351_v40  ;;  %389 = vmatmul.bf16.vlgmr.msra.gmra.mxu2 %v442_v45 }
  0x23   :  { %403 = vmatmul.bf16.vlgmr.msra.gmra.mxu3 %v446_v46 }
  0x24   :  { %375 = vmatmul.bf16.vlgmr.msra.gmra.mxu1 %v438_v47 }
  0x26   :  { %413 = vmatpush.bf16.msrb.mxu0 %v640_v48 }
  0x2a   :  { %414 = vmatpush.bf16.msrb.mxu0 %v639_v49 }
  0x2e   :  { %415 = vmatpush.bf16.msrb.mxu0 %v638_v50 }
  0x32   :  { %416 = vmatpush.bf16.msrb.mxu0 %v637_v51 }
  0x35   :  { %599 = vmatmul.msk.bf16.vlgmr.msrb.gmra.mxu0 %vm345_vm1, %v450_v54 }
  0x9e   :  { %v362_v56 = vpop.f32.mrf.mxu0 }
  0x9f   :  { %v363_v57 = vadd.f32 %v642_v55, %v362_v56 }
  0xa1   :  { %v376_v58 = vpop.f32.mrf.mxu1 }
  0xa2   :  { %v377_v60 = vadd.f32 %v376_v58, %v363_v57 }
  0xa5   :  { %v390_v59 = vpop.f32.mrf.mxu2 }
  0xa6   :  { %v364_v61 = vpop.f32.mrf.mxu0  ;;  %v404_v62 = vpop.f32.mrf.mxu3  ;;  %v391_v63 = vadd.f32 %v390_v59, %v377_v60 }
  0xa7   :  { %v365_v0 = vadd.f32 %v642_v55, %v364_v61 }
  0xa8   :  { %v405_v2 = vadd.f32 %v404_v62, %v391_v63 }
  0xa9   :  { %v378_v1 = vpop.f32.mrf.mxu1 }
  0xaa   :  { %v379_v5 = vadd.f32 %v378_v1, %v365_v0 }
  0xad   :  { %v392_v3 = vpop.f32.mrf.mxu2 }
  0xae   :  { %v393_v7 = vadd.f32 %v392_v3, %v379_v5  ;;  %v406_v8 = vpop.f32.mrf.mxu3 }
  0xb0   :  { %v407_v9 = vadd.f32 %v406_v8, %v393_v7 }
  0xb2   :  { %v418_v4 = vpop.f32.mrf.mxu0 }
  0xb3   :  { %v419_v6 = vadd.f32 %v418_v4, %v405_v2 }
  0xb5   :  { %424 = vst.msk [vmem:[%s819_s3] sm:$0xff] %vm423_vm2, %v419_v6 }
  0xba   :  { %v420_v10 = vpop.f32.mrf.mxu0 }
  0xbb   :  { %v421_v11 = vadd.f32 %v420_v10, %v407_v9 }
  0xbd   :  { %426 = vst.msk [vmem:[%s819_s3 + $0x8] sm:$0xf] %vm425_vm3, %v421_v11 }

// kernel: squeeze.3
= control target key start
LH: loop header
LB: loop body
LE: loop exit
PB: predicated region body
PF: predicated region fallthrough
CT: control target
= control target key end

     0   :  { %s86_s0 = inlined_call_operand.vmem [shape: f32[2,6], index: 0, kind: input, shape index: {}]   ;;  %s87_s1 = inlined_call_operand.hbm [shape: f32[2,2,3], index: 1, kind: output, shape index: {}]  }
   0x1   :  { %v5_v0 = vld [vmem:[%s86_s0] sm:$0x3] }
   0x2   :  { %2 = vsyncpa [#allocation1], 0  ;;  %6 = vst [vmem:[#allocation3] sm:$0x3] %v5_v0  ;;  %vm8_vm0 = vcmask 23552   ;;  %s68_s0 = smov 125  }
   0x3   :  { %s69_s8 = smov [#allocation0]   ;;  %s33_s1 = sshll.u32 %s87_s1, 4  ;;  %s34_s1 = int_to_ptr.hbm [resolvable:$true] %s33_s1 }
   0x4   :  { %s31_s9 = sshll.u32 %s69_s8, 4  ;;  %s32_s9 = int_to_ptr.vmem [resolvable:$true] %s31_s9 }
   0x9   :  { %v10_v1 = vld [vmem:[#allocation3] sm:$0x3]  }
   0xa   :  { %v7_v2 = vld [vmem:[#allocation3] sm:$0x3]   ;;  %11 = vrot.lane.b32.xlu0 %v10_v1, %s68_s0 }
   0xb   :  { %9 = vst.msk [vmem:[#allocation2] ss:$8 sm:$0x3] %vm8_vm0, %v7_v2  }
  0x7c   :  { %v12_v3 = vpop.permute.xlu0 %11  }
  0x7d   :  { %15 = vst.msk [vmem:[#allocation2 + $0x1] ss:$8 sm:$0x3] %vm8_vm0, %v12_v3  }
  0x84   :  { %v18_v4 = vld [vmem:[#allocation2] sm:$0x3]  ;;  %v23_v5 = vld [vmem:[#allocation2 + $0x8] sm:$0x3] }
  0x85   :  { %21 = vst [vmem:[#allocation0] sm:$0x3] %v18_v4 }
  0x86   :  { %27 = vst [vmem:[#allocation0 + $0x2] sm:$0x3] %v23_v5 }
  0x87   :  { %36 = dma.vmem_to_hbm [thread:$0]  %s32_s9, 64, %s34_s1, [#allocation1]  }
  0x88   :  { %66 = dma.done.wait [#allocation1], 64  }
  0x89   :  { %67 = vsyncadd [#allocation1], 4294967232 }
  0x8a   :  { %39 = vsyncpa [#allocation1], 1 }

// kernel: image_depth_anything_encoder.7
= control target key start
LH: loop header
LB: loop body
LE: loop exit
PB: predicated region body
PF: predicated region fallthrough
CT: control target
= control target key end

     0   :  { %s545_s22 = smov 0   ;;  %s547_s23 = smov 0   ;;  %s597_s0 = inlined_call_operand.vmem [shape: f32[2,1,2,3], index: 0, kind: input, shape index: {}]   ;;  %s598_s1 = inlined_call_operand.vmem [shape: f32[28,2], index: 1, kind: input, shape index: {}]   ;;  %s599_s2 = inlined_call_operand.vmem [shape: f32[3,42], index: 2, kind: input, shape index: {}]   ;;  %s600_s3 = inlined_call_operand.<no memory space> [shape: f32[1], index: 3, kind: input, shape index: {}]   ;;  %s601_s4 = inlined_call_operand.<no memory space> [shape: f32[1], index: 4, kind: input, shape index: {}]   ;;  %s602_s5 = inlined_call_operand.vmem [shape: f32[2,1,28,42], index: 5, kind: output, shape index: {}]  }
   0x1   :  { %10 = sst [smem:[#allocation2]] %s600_s3  ;;  %s549_s24 = smov 0  }
   0x2   :  { %11 = sst [smem:[#allocation3]] %s601_s4 }
   0x3 LB: > { %s29_s3 = sadd.s32 1, %s503_s23  ;;  %p445_p0 = scmp.ge.s32.totalorder %s507_s24, 1  ;;  %s507_s24 = sphi %s549_s24, %s17_s24   ;;  %s503_s23 = sphi %s547_s23, %s604_s23   ;;  %s499_s22 = sphi %s545_s22, %s603_s22  }
   0x4   : > { %p31_p1 = scmp.ge.s32.totalorder %s29_s3, 2  ;;  %p207_p2 = scmp.lt.s32.totalorder %s507_s24, 3 }
   0x6   : > { %s606_s3 = smov (%p31_p1, %s29_s3), 0  ;;  %p208_p3 = pnand %p445_p0, %p207_p2 }
   0x7   : > { %p241_p4 = scmp.lt.s32.totalorder (!%p208_p3), %s499_s22, 1  ;;  %s337_s13 = sld [smem:[#allocation2]] (!%p208_p3) }
   0x8   : > { %211 = sbr.rel (%p208_p3) target bundleno = 289 (0x121), region = 40  ;;  %s343_s14 = sld [smem:[#allocation3]] (!%p208_p3) }
   0xd   : > { %v262_v0 = vld [vmem:[%s599_s2] sm:$0x7]  ;;  %vm267_vm0 = vcmask 1042432   ;;  %s608_s22 = smov (!%p241_p4, %s499_s22), 1  ;;  %vm263_vm1 = vcmask 23552   ;;  %vm304_vm2 = vcmask 1041408   ;;  %v338_v7 = vstv %s337_s13 }
   0xe   : > { %449 = vmatpush.msk.msra.mxu0 %vm267_vm0, %v262_v0  ;;  %s446_s26 = sshll.u32 %s608_s22, 1  ;;  %v259_v2 = vld [vmem:[%s598_s1 + $0x8] sm:$0xff]  ;;  %vm291_vm3 = vcmask 15360   ;;  %v261_v4 = vld [vmem:[%s598_s1 + $0x18] sm:$0xf]  ;;  %v258_v5 = vld [vmem:[%s598_s1] sm:$0xff]  ;;  %v344_v10 = vstv %s343_s14 }
   0xf   : > { %s247_s29 = scalar_lea.vmem %s597_s0, %s446_s26  ;;  %v260_v6 = vld [vmem:[%s598_s1 + $0x10] sm:$0xff]  ;;  %s458_s15 = sshll.u32 %s608_s22, 5  ;;  %vm349_vm4 = vcmask 343040   ;;  %vm353_vm5 = vcmask 338944  }
  0x10   : > { %v257_v1 = vld [vmem:[%s247_s29] sm:$0x3]  ;;  %s256_s18 = scalar_lea.vmem %s602_s5, %s458_s15 }
  0x11   : > { %450 = vmatmul.msk.f32.vlgmr.msra.gmra.mxu0 %vm263_vm1, %v257_v1 }
  0x8e   : > { %v288_v3 = vpop.f32.mrf.mxu0 }
  0x8f   : > { %451 = vmatpush.msk.msra.mxu1 %vm304_vm2, %v288_v3  ;;  %459 = vmatpush.msk.msra.mxu2 %vm304_vm2, %v288_v3 }
  0x90   : > { %460 = vmatpush.msk.msra.mxu3 %vm304_vm2, %v288_v3  ;;  %453 = vmatmul.msk.f32.vlgmr.msra.gmra.mxu2 %vm291_vm3, %v259_v2 }
  0x91   : > { %455 = vmatmul.msk.f32.vlgmr.msra.gmra.mxu3 %vm291_vm3, %v261_v4  ;;  %452 = vmatmul.msk.f32.vlgmr.msra.gmra.mxu1 %vm291_vm3, %v258_v5 }
  0x98   : > { %454 = vmatmul.msk.f32.gmra.mxu2 %vm291_vm3, %v260_v6 }
 0x10e   : > { %v325_v8 = vpop.f32.mrf.mxu1 }
 0x10f   : > { %v339_v9 = vmul.f32 %v338_v7, %v325_v8 }
 0x111   : > { %v345_v11 = vadd.f32 %v344_v10, %v339_v9 }
 0x113   : > { %v328_v12 = vpop.f32.mrf.mxu2  ;;  %350 = vst.msk [vmem:[%s256_s18] sm:$0xff] %vm349_vm4, %v345_v11 }
 0x114   : > { %v340_v13 = vmul.f32 %v338_v7, %v328_v12  ;;  %v334_v14 = vpop.f32.mrf.mxu3 }
 0x115   : > { %v342_v15 = vmul.f32 %v338_v7, %v334_v14 }
 0x116   : > { %v346_v16 = vadd.f32 %v344_v10, %v340_v13 }
 0x117   : > { %v348_v17 = vadd.f32 %v344_v10, %v342_v15 }
 0x118   : > { %351 = vst.msk [vmem:[%s256_s18 + $0x8] sm:$0xff] %vm349_vm4, %v346_v16 }
 0x119   : > { %354 = vst.msk [vmem:[%s256_s18 + $0x18] sm:$0xf] %vm353_vm5, %v348_v17 }
 0x11b   : > { %v331_v18 = vpop.f32.mrf.mxu2 }
 0x11c   : > { %v341_v19 = vmul.f32 %v338_v7, %v331_v18 }
 0x11e   : > { %v347_v20 = vadd.f32 %v344_v10, %v341_v19 }
 0x120   : > { %352 = vst.msk [vmem:[%s256_s18 + $0x10] sm:$0xff] %vm349_vm4, %v347_v20 }
 0x121 PF: > { %s17_s24 = sadd.s32 1, %s507_s24   ;;  %s603_s22 = smov %s503_s23 }
 0x122   : > { %p14_p5 = scmp.ge.s32.totalorder %s17_s24, 4   ;;  %s604_s23 = smov %s606_s3 }
 0x124   :  { %16 = sbr.rel (!%p14_p5) target bundleno = 3 (0x3), region = 70 }

// kernel: image_depth_anything_encoder.6
= control target key start
LH: loop header
LB: loop body
LE: loop exit
PB: predicated region body
PF: predicated region fallthrough
CT: control target
= control target key end

     0   :  { %s2296_s0 = inlined_call_operand.vmem [shape: f32[2,7,32], index: 0, kind: input, shape index: {}]   ;;  %s2297_s1 = inlined_call_operand.vmem [shape: f32[2,1,32], index: 1, kind: input, shape index: {}]   ;;  %s2298_s2 = inlined_call_operand.vmem [shape: f32[2,1,32], index: 2, kind: input, shape index: {}]   ;;  %s2299_s3 = inlined_call_operand.vmem [shape: bf16[2,32,96], index: 3, kind: input, shape index: {}]   ;;  %s2300_s4 = inlined_call_operand.vmem [shape: f32[2,1,96], index: 4, kind: input, shape index: {}]   ;;  %s2301_s5 = inlined_call_operand.vmem [shape: bf16[2,32,32], index: 5, kind: input, shape index: {}]   ;;  %s2302_s6 = inlined_call_operand.vmem [shape: f32[2,1,32], index: 6, kind: input, shape index: {}]   ;;  %s2303_s7 = inlined_call_operand.vmem [shape: f32[2,1,32], index: 7, kind: input, shape index: {}]   ;;  %s2304_s8 = inlined_call_operand.vmem [shape: f32[2,1,32], index: 8, kind: input, shape index: {}]   ;;  %s2305_s9 = inlined_call_operand.vmem [shape: bf16[2,32,128], index: 9, kind: input, shape index: {}]   ;;  %s2306_s10 = inlined_call_operand.vmem [shape: f32[2,1,128], index: 10, kind: input, shape index: {}]   ;;  %s2307_s11 = inlined_call_operand.vmem [shape: bf16[2,128,32], index: 11, kind: input, shape index: {}]   ;;  %s2308_s12 = inlined_call_operand.vmem [shape: f32[2,1,32], index: 12, kind: input, shape index: {}]   ;;  %s2309_s13 = inlined_call_operand.vmem [shape: f32[1,32], index: 13, kind: input, shape index: {}]   ;;  %s2310_s14 = inlined_call_operand.<no memory space> [shape: f32[1], index: 14, kind: input, shape index: {}]   ;;  %s2311_s15 = inlined_call_operand.hbm [shape: f32[2,1,64], index: 15, kind: output, shape index: {0}]   ;;  %s2312_s16 = inlined_call_operand.vmem [shape: f32[2,1,7], index: 16, kind: output, shape index: {1}]   ;;  %s2313_s17 = inlined_call_operand.vmem [shape: f32[2,1,6], index: 17, kind: output, shape index: {2}]  }
   0x1   :  { %2327 = sst [smem:[#allocation20_spill]] %s2296_s0 }
   0x2   :  { %2328 = sst [smem:[#allocation21_spill]] %s2297_s1 }
   0x3   :  { %2329 = sst [smem:[#allocation22_spill]] %s2299_s3 }
   0x4   :  { %2330 = sst [smem:[#allocation23_spill]] %s2301_s5 }
   0x5   :  { %2331 = sst [smem:[#allocation24_spill]] %s2303_s7 }
   0x6   :  { %2332 = sst [smem:[#allocation25_spill]] %s2305_s9 }
   0x7   :  { %2333 = sst [smem:[#allocation26_spill]] %s2307_s11 }
   0x8   :  { %2334 = sst [smem:[#allocation27_spill]] %s2308_s12 }
   0x9   :  { %2335 = sst [smem:[#allocation28_spill]] %s2309_s13 }
   0xa   :  { %2336 = sst [smem:[#allocation29_spill]] %s2311_s15 }
   0xb   :  { %2337 = sst [smem:[#allocation30_spill]] %s2312_s16 }
   0xc   :  { %2338 = sst [smem:[#allocation31_spill]] %s2313_s17 }
   0xd   :  { %23 = sst [smem:[#allocation4]] %s2310_s14 }
   0xe   :  { %24 = vsyncpa [#allocation6], 0 }
   0xf   :  { %26 = vsyncpa [#allocation6 + $0x1], 0  ;;  %s1955_s26 = smov 0   ;;  %s1957_s27 = smov 0  }
  0x10   :  { %s1959_s28 = smov 0   ;;  %s1961_s29 = smov 0  }
  0x11   :  { %s1963_s0 = smov 0   ;;  %s1965_s30 = smov 0  }
  0x12   :  { %s1967_s18 = smov 0   ;;  %s1969_s19 = smov 0  }
  0x13 LB: > { %2339 = sst [smem:[#allocation8_spill]] %s1824_s26  ;;  %s1552_s14 = sadd.s32 4294967295, %s1852_s19   ;;  %s1852_s19 = sphi %s1969_s19, %s32_s19   ;;  %s1848_s18 = sphi %s1967_s18, %s2393_s18   ;;  %s1844_s30 = sphi %s1965_s30, %s2392_s30   ;;  %s1840_s0 = sphi %s1963_s0, %s2391_s0   ;;  %s1836_s29 = sphi %s1961_s29, %s2390_s29   ;;  %s1832_s28 = sphi %s1959_s28, %s2389_s28   ;;  %s1828_s27 = sphi %s1957_s27, %s2395_s27   ;;  %s1824_s26 = sphi %s1955_s26, %s2394_s26  }
  0x14   : > { %2340 = sst [smem:[#allocation9_spill]] %s1832_s28  ;;  %s1553_s1 = sadd.s32 4294967294, %s1852_s19  }
  0x15   : > { %2341 = sst [smem:[#allocation10_spill]] %s1836_s29  ;;  %s41_s20 = sadd.s32 1, %s1844_s30 }
  0x16   : > { %2342 = sst [smem:[#allocation11_spill]] %s1840_s0  ;;  %p42_p0 = scmp.ge.s32.totalorder %s41_s20, 2 }
  0x17   : > { %2343 = sst [smem:[#allocation12_spill]] %s1844_s30  ;;  %s44_s21 = sadd.s32 1, %s1848_s18 }
  0x18   : > { %2344 = sst [smem:[#allocation13_spill]] %s1848_s18  ;;  %p441_p1 = scmp.ne.s32.totalorder %s1832_s28, %s1828_s27 }
  0x19   : > { %2345 = sst [smem:[#allocation14_spill]] %s1852_s19  ;;  %p442_p2 = scmp.eq.s32.totalorder %s1552_s14, 3 }
  0x1a   : > { %s2397_s20 = smov (%p42_p0, %s41_s20), 0  ;;  %s2399_s21 = smov (!%p42_p0, %s44_s21), %s1848_s18 }
  0x1b   : > { %2346 = sst [smem:[#allocation15_spill]] %s2397_s20  ;;  %p2004_p3 = por %p442_p2, %p441_p1 }
  0x1c   : > { %p447_p4 = scmp.ne.s32.totalorder %s1828_s27, %s1824_s26  ;;  %p46_p5 = scmp.ge.s32.totalorder %s2399_s21, 2 }
  0x1d   : > { %s2347_s22 = scalar_select %p2004_p3, 1, 0 }
  0x1e   : > { %p448_p6 = scmp.eq.s32.totalorder %s1553_s1, 3  ;;  %p1556_p7 = scmp.ge.s32.totalorder %s1852_s19, 1 }
  0x1f   : > { %2348 = sst [smem:[#allocation16_spill]] %s2347_s22  ;;  %p611_p8 = scmp.lt.s32.totalorder %s1852_s19, 5 }
  0x20   : > { %s2401_s21 = smov (%p46_p5, %s2399_s21), 0  ;;  %p2014_p9 = por %p448_p6, %p447_p4 }
  0x21   : > { %2349 = sst [smem:[#allocation17_spill]] %s2401_s21  ;;  %p612_p10 = pnand %p1556_p7, %p611_p8 }
  0x22   : > { %s2350_s23 = scalar_select %p2014_p9, 1, 0 }
  0x23   : > { %s428_s24 = ssub.s32 %s1848_s18, %s2401_s21  ;;  %s431_s25 = sadd.s32 1, %s1832_s28 }
  0x24   : > { %2351 = sst [smem:[#allocation18_spill]] %s2350_s23  ;;  %p429_p11 = scmp.eq.s32.totalorder %s428_s24, 0 }
  0x25   : > { %615 = sbr.rel (%p612_p10) target bundleno = 1965 (0x7ad), region = 80  ;;  %p711_p12 = scmp.lt.s32.totalorder (!%p612_p10), %s1840_s0, 1 }
  0x26   : > { %s2022_s14 = scalar_select %p429_p11, %s1832_s28, %s431_s25  }
  0x27   : > { %p715_p13 = scmp.lt.s32.totalorder (!%p612_p10), %s1836_s29, 1  ;;  %s2354_s28 = sld [smem:[#allocation20_spill]] (!%p612_p10) }
  0x28   : > { %2352 = sst [smem:[#allocation19_spill]] %s2022_s14 }
  0x29   : > { %s2356_s3 = sld [smem:[#allocation22_spill]] (!%p612_p10) }
  0x2a   : > { %s2028_s20 = scalar_select %p711_p12, %s1840_s0, 1 }
  0x2b   : > { %s2031_s30 = scalar_select %p715_p13, %s1836_s29, 1 }
  0x2c   : > { %s1557_s24 = sshll.u32 %s2028_s20, 3  ;;  %s2357_s5 = sld [smem:[#allocation23_spill]] }
  0x2d   : > { %s714_s23 = scalar_lea.vmem %s2354_s28, %s1557_s24  ;;  %s1635_s17 = sshll.u32 %s2031_s30, 4 }
  0x2e   : > { %s2359_s9 = sld [smem:[#allocation25_spill]]  ;;  %s750_s18 = scalar_lea.vmem %s2306_s10, %s2031_s30 }
  0x2f   : > { %s725_s1 = scalar_lea.vmem %s2356_s3, %s1635_s17  ;;  %s2360_s22 = sld [smem:[#allocation27_spill]] }
  0x30   : > { %s2361_s29 = sld [smem:[#allocation26_spill]] }
  0x31   : > { %s2362_s12 = sld [smem:[#allocation31_spill]] }
  0x32   : > { %s2060_s24 = scalar_lea.vmem %s2357_s5, %s1635_s17  ;;  %s1638_s5 = sshll.u32 %s2031_s30, 6 }
  0x34   : > { %s2077_s25 = scalar_lea.vmem %s2359_s9, %s1635_s17  ;;  %s2363_s17 = sand.u32 1, %s1828_s27  }
  0x35   : > { %s758_s16 = scalar_lea.vmem %s2360_s22, %s2031_s30  ;;  %s2099_s21 = scalar_lea.vmem [#allocation5], %s2363_s17 }
  0x36   : > { %s2091_s7 = scalar_lea.vmem %s2361_s29, %s1638_s5  ;;  %s2364_s9 = sld [smem:[#allocation10_spill]] }
  0x37   : > { %s764_s3 = scalar_lea.vmem %s2362_s12, %s2028_s20 }
  0x3c   : > { %p1566_p0 = scmp.ne.s32.totalorder %s2364_s9, 0 }
  0x3e   : > { %769 = sbr.rel (%p1566_p0) target bundleno = 69 (0x45), region = 84 }
  0x43   : > { %v770_v0 = vld [vmem:[%s714_s23] sm:$0x7f]  ;;  %vm771_vm0 = vcmask 260096  }
  0x44   : > { %772 = vst.msk [vmem:[#allocation2] sm:$0x7f] %vm771_vm0, %v770_v0 }
  0x45 PF: > { %vm774_vm1 = vcmask 260096   ;;  %v1640_v5 = vld [vmem:[%s725_s1 + $0x8] sm:$0xff]  ;;  %v1639_v7 = vld [vmem:[%s725_s1] sm:$0xff]  ;;  %s2365_s29 = sld [smem:[#allocation21_spill]]  ;;  %s2367_s12 = scalar_lea.vmem %s2298_s2, %s2031_s30  ;;  %vm830_vm5 = vcmask 261120   ;;  %vm858_vm6 = vcmask 130048  }
  0x46   : > { %840 = vmatpush.bf16.msra.mxu0 %v1640_v5  ;;  %v1733_v24 = vld [vmem:[%s2367_s12] ss:$0 sm:$0xff]  ;;  %s2368_s26 = scalar_lea.vmem %s2300_s4, %s2031_s30  ;;  %s1854_s19 = smov 112   ;;  %vm904_vm7 = vcmask 55296   ;;  %vm935_vm8 = vcmask 1042432   ;;  %vm936_vm9 = vcmask 1043456  }
  0x47   : > { %v1734_v28 = vld [vmem:[%s2368_s26] ss:$0 sm:$0xff]  ;;  %s1855_s13 = smov 96   ;;  %s1856_s0 = smov 64   ;;  %v1857_v61 = vmov 65535   ;;  %vm931_vm10 = vcmask 56320  }
  0x48   : > { %v937_v62 = vsel %vm935_vm8, 4294967295, %v1857_v61  ;;  %vm976_vm11 = vcmask 129024   ;;  %s1858_s15 = smov 16   ;;  %vm982_vm12 = vcmask 260224   ;;  %s2369_s5 = scalar_lea.vmem %s2302_s6, %s2031_s30  ;;  %v1645_v61 = vld [vmem:[%s2091_s7] sm:$0xff] }
  0x49   : > { %v938_v63 = vsel %vm936_vm9, %v937_v62, 0  ;;  %s2370_s9 = sld [smem:[#allocation24_spill]]  ;;  %s2372_s22 = scalar_lea.vmem %s2304_s8, %s2031_s30  ;;  %v1738_v62 = vld [vmem:[%s750_s18] ss:$0 sm:$0xff] }
  0x4a   : > { %841 = vmatpush.bf16.msra.mxu0 %v1639_v7  ;;  %s2374_s18 = sld [smem:[#allocation10_spill]] }
  0x4b   : > { %v2102_v1 = vld [vmem:[#allocation2] sm:$0x7f]  ;;  %s2366_s23 = scalar_lea.vmem %s2365_s29, %s2031_s30 }
  0x4c   : > { %v775_v2 = vsel %vm774_vm1, %v2102_v1, 0.0  ;;  %v779_v3 = vmul.f32 %v2102_v1, %v2102_v1  ;;  %v1732_v21 = vld [vmem:[%s2366_s23] ss:$0 sm:$0xff] }
  0x4d   : > { %776 = vadd.xlane.f32.xlu0 %v775_v2 }
  0x4e   : > { %v780_v4 = vsel %vm774_vm1, %v779_v3, 0.0 }
  0x4f   : > { %s2371_s29 = scalar_lea.vmem %s2370_s9, %s2031_s30 }
  0x50   : > { %p1630_p1 = scmp.ne.s32.totalorder %s2374_s18, 1 }
  0x51   : > { %s2378_s11 = sld [smem:[#allocation30_spill]] (!%p1630_p1) }
  0x55   : > { %781 = vadd.xlane.f32.xlu0 %v780_v4 }
  0x57   : > { %s2379_s17 = scalar_lea.vmem (!%p1630_p1), %s2378_s11, %s2028_s20 }
  0xc0   : > { %v777_v6 = vpop.xlane.xlu0 %776 }
  0xc1   : > { %v778_v8 = vmul.f32 0.03125, %v777_v6 }
  0xc3   : > { %v785_v10 = vmul.f32 %v778_v8, %v778_v8  ;;  %v784_v20 = vsub.f32 %v2102_v1, %v778_v8 }
  0xc8   : > { %v782_v9 = vpop.xlane.xlu0 %781 }
  0xc9   : > { %v783_v11 = vmul.f32 0.03125, %v782_v9 }
  0xcb   : > { %v786_v12 = vsub.f32 %v783_v11, %v785_v10 }
  0xcd   : > { %v787_v13 = vadd.f32 1e-06, %v786_v12 }
  0xcf   : > { %1740 = vrsqrt.f32 %v787_v13  ;;  %vm794_vm3 = vweird.f32 %v787_v13 }
  0xd5   : > { %v1741_v14 = vpop.eup %1740 }
  0xd6   : > { %v789_v15 = vmul.f32 %v1741_v14, %v787_v13  ;;  %vm795_vm2 = vweird.f32 %v1741_v14 }
  0xd7   : > { %vm796_vm4 = vmor %vm794_vm3, %vm795_vm2 }
  0xd8   : > { %v790_v16 = vmul.f32 %v1741_v14, %v789_v15  ;;  %v1642_v15 = vld [vmem:[%s2060_s24 + $0x8] sm:$0xff] }
  0xd9   : > { %1011 = vmatpush.bf16.msrb.mxu0 %v1642_v15 }
  0xda   : > { %v791_v17 = vmul.f32 0.5, %v790_v16 }
  0xdc   : > { %v792_v18 = vsub.f32 1.5, %v791_v17 }
  0xde   : > { %v793_v19 = vmul.f32 %v1741_v14, %v792_v18  ;;  %v1641_v18 = vld [vmem:[%s2060_s24] sm:$0xff] }
  0xdf   : > { %1012 = vmatpush.bf16.msrb.mxu0 %v1641_v18 }
  0xe0   : > { %v797_v22 = vsel %vm796_vm4, %v1741_v14, %v793_v19 }
  0xe1   : > { %v798_v23 = vmul.f32 %v797_v22, %v784_v20  ;;  %v1735_v22 = vld [vmem:[%s2369_s5] ss:$0 sm:$0xff]  ;;  %s1273_s5 = sld [smem:[#allocation4]] (!%p1630_p1) }
  0xe3   : > { %v803_v25 = vmul.f32 %v1732_v21, %v798_v23 }
  0xe5   : > { %v808_v26 = vadd.f32 %v1733_v24, %v803_v25 }
  0xe7   : > { %v809_v27 = vpack.c.bf16 %v808_v26, %v808_v26 }
  0xe9   : > { %1575 = vmatmul.msk.bf16.vlgmr.msra.gmra.mxu0 %vm830_vm5, %v809_v27 }
 0x166   : > { %v843_v29 = vpop.f32.mrf.mxu0 }
 0x167   : > { %v844_v30 = vadd.f32 %v1734_v28, %v843_v29 }
 0x169   : > { %v851_v31 = vpack.c.bf16 %v844_v30, %v844_v30  ;;  %848 = vrot.lane.b32.xlu1 %v844_v30, %s1854_s19  ;;  %v1644_v30 = vld [vmem:[%s2077_s25 + $0x8] sm:$0xff]  ;;  %s2375_s19 = sld [smem:[#allocation28_spill]] (!%p1630_p1) }
 0x16b   : > { %v854_v32 = vunpack.c.l.b16 %v851_v31 }
 0x16d   : > { %v855_v34 = vpack.c.b16 %v854_v32, %v854_v32 }
 0x16e   : > { %v845_v33 = vpop.f32.mrf.mxu0 }
 0x171   : > { %856 = vrot.lane.b32.xlu1 %v855_v34, %s1855_s13 }
 0x1db   : > { %v849_v35 = vpop.permute.xlu1 %848 }
 0x1dc   : > { %v852_v36 = vpack.c.bf16 %v849_v35, %v849_v35 }
 0x1de   : > { %v879_v37 = vunpack.c.l.b16 %v852_v36 }
 0x1e0   : > { %v880_v38 = vpack.c.b16 %v879_v37, %v879_v37 }
 0x1e2   : > { %881 = vrot.lane.b32.xlu2 %v880_v38, %s1855_s13  ;;  %s1861_s13 = smov (!%p1630_p1), 32  }
 0x1e3   : > { %v857_v39 = vpop.permute.xlu1 %856 }
 0x1e4   : > { %v863_v40 = vsel %vm858_vm6, %v857_v39, 0 }
 0x1e5   : > { %872 = vmatpush.bf16.xpose.msra.mxu1 %v863_v40 }
 0x1ec   : > { %1576 = vmatmul.msk.bf16.vlgmr.msra.gmra.mxu1 %vm858_vm6, %v851_v31  ;;  %v1643_v31 = vld [vmem:[%s2077_s25] sm:$0xff] }
 0x1ed   : > { %1088 = vmatpush.bf16.msrb.mxu1 %v1644_v30 }
 0x1f1   : > { %1089 = vmatpush.bf16.msrb.mxu1 %v1643_v31 }
 0x23c   : > { %v882_v41 = vpop.permute.xlu2 %881 }
 0x23d   : > { %v887_v42 = vsel %vm858_vm6, %v882_v41, 0 }
 0x23e   : > { %896 = vmatpush.bf16.xpose.msra.mxu2 %v887_v42 }
 0x245   : > { %1577 = vmatmul.msk.bf16.vlgmr.msra.gmra.mxu2 %vm858_vm6, %v852_v36  ;;  %v1652_v36 = vld [vmem:[%s2091_s7 + $0x38] sm:$0xff] }
 0x246   : > { %1173 = vmatpush.bf16.msrb.mxu2 %v1652_v36 }
 0x269   : > { %v874_v43 = vpop.f32.mrf.mxu1 }
 0x26a   : > { %v902_v44 = vmul.f32 0.25, %v874_v43 }
 0x26c   : > { %v905_v45 = vsel %vm904_vm7, %v902_v44, -inf }
 0x26d   : > { %906 = vmax.xlane.f32.xlu2 %v905_v45 }
 0x271   : > { %v876_v46 = vpop.f32.mrf.mxu1 }
 0x272   : > { %v1736_v46 = vld [vmem:[%s2371_s29] ss:$0 sm:$0xff] }
 0x285   : > { %955 = vrot.lane.b32.xlu2 %v880_v38, %s1856_s0 }
 0x2c8   : > { %v898_v47 = vpop.f32.mrf.mxu2 }
 0x2c9   : > { %v903_v48 = vmul.f32 0.25, %v898_v47 }
 0x2cb   : > { %v908_v49 = vsel %vm904_vm7, %v903_v48, -inf }
 0x2cc   : > { %909 = vmax.xlane.f32.xlu0 %v908_v49  ;;  %v1737_v49 = vld [vmem:[%s2372_s22] ss:$0 sm:$0xff] }
 0x2d0   : > { %v900_v50 = vpop.f32.mrf.mxu2 }
 0x2e0   : > { %929 = vrot.lane.b32.xlu0 %v855_v34, %s1856_s0  ;;  %v907_v51 = vpop.xlane.xlu2 %906 }
 0x2e1   : > { %v911_v52 = vsub.f32 %v902_v44, %v907_v51 }
 0x2e3   : > { %v913_v53 = vmul.f32 1.442695, %v911_v52 }
 0x2e5   : > { %1742 = vpow2.f32 %v913_v53  ;;  %v1651_v53 = vld [vmem:[%s2091_s7 + $0x30] sm:$0xff] }
 0x2e6   : > { %1174 = vmatpush.bf16.msrb.mxu2 %v1651_v53 }
 0x2e8   : > { %v956_v0 = vpop.permute.xlu2 %955 }
 0x2e9   : > { %v961_v4 = vand.u32 %v956_v0, %v938_v63 }
 0x2eb   : > { %v2128_v54 = vpop.eup %1742 }
 0x2ec   : > { %v917_v55 = vsel %vm904_vm7, %v2128_v54, 0.0 }
 0x2ed   : > { %918 = vadd.xlane.f32.xlu1 %v917_v55  ;;  %v1650_v55 = vld [vmem:[%s2091_s7 + $0x28] sm:$0xff] }
 0x2ee   : > { %1175 = vmatpush.bf16.msrb.mxu2 %v1650_v55 }
 0x33f   : > { %v910_v56 = vpop.xlane.xlu0 %909 }
 0x340   : > { %v912_v57 = vsub.f32 %v903_v48, %v910_v56  ;;  %v1649_v56 = vld [vmem:[%s2091_s7 + $0x20] sm:$0xff] }
 0x341   : > { %1176 = vmatpush.bf16.msrb.mxu2 %v1649_v56 }
 0x342   : > { %v915_v58 = vmul.f32 1.442695, %v912_v57  ;;  %v1648_v57 = vld [vmem:[%s2091_s7 + $0x18] sm:$0xff] }
 0x344   : > { %1744 = vpow2.f32 %v915_v58  ;;  %v1647_v58 = vld [vmem:[%s2091_s7 + $0x10] sm:$0xff] }
 0x345   : > { %1177 = vmatpush.bf16.msrb.mxu2 %v1648_v57 }
 0x349   : > { %1178 = vmatpush.bf16.msrb.mxu2 %v1647_v58 }
 0x34a   : > { %v2132_v59 = vpop.eup %1744 }
 0x34b   : > { %v920_v60 = vsel %vm904_vm7, %v2132_v59, 0.0 }
 0x34c   : > { %921 = vadd.xlane.f32.xlu0 %v920_v60  ;;  %v1646_v60 = vld [vmem:[%s2091_s7 + $0x8] sm:$0xff] }
 0x34d   : > { %1179 = vmatpush.bf16.msrb.mxu2 %v1646_v60 }
 0x351   : > { %1180 = vmatpush.bf16.msrb.mxu2 %v1645_v61 }
 0x352   : > { %v930_v2 = vpop.permute.xlu0 %929 }
 0x353   : > { %v940_v3 = vand.u32 %v938_v63, %v930_v2 }
 0x355   : > { %949 = vmatpush.bf16.msra.mxu3 %v940_v3 }
 0x359   : > { %970 = vmatpush.bf16.msrb.mxu3 %v961_v4 }
 0x360   : > { %v2136_v5 = vpop.xlane.xlu1 %918 }
 0x361   : > { %1746 = vrcp.f32 %v2136_v5 }
 0x367   : > { %v2139_v6 = vpop.eup %1746 }
 0x368   : > { %v925_v7 = vmul.f32 %v2139_v6, %v2128_v54 }
 0x36a   : > { %v927_v8 = vpack.c.bf16 %v925_v7, %v925_v7 }
 0x36c   : > { %1578 = vmatmul.msk.bf16.vlgmr.msra.gmra.mxu3 %vm931_vm10, %v927_v8 }
 0x3bf   : > { %v2143_v9 = vpop.xlane.xlu0 %921 }
 0x3c0   : > { %1748 = vrcp.f32 %v2143_v9 }
 0x3c6   : > { %v2146_v10 = vpop.eup %1748 }
 0x3c7   : > { %v926_v11 = vmul.f32 %v2146_v10, %v2132_v59 }
 0x3c9   : > { %v928_v12 = vpack.c.bf16 %v926_v11, %v926_v11 }
 0x3cb   : > { %1579 = vmatmul.msk.bf16.vlgmr.msrb.gmra.mxu3 %vm931_vm10, %v928_v12 }
 0x3ef   : > { %v951_v13 = vpop.f32.mrf.mxu3 }
 0x3f0   : > { %977 = vst.msk [vmem:[#allocation3] sm:$0x7f] %vm976_vm11, %v951_v13 }
 0x3f7   : > { %v953_v14 = vpop.f32.mrf.mxu3 }
 0x44e   : > { %v972_v16 = vpop.f32.mrf.mxu3 }
 0x44f   : > { %979 = vrot.lane.b32.xlu1 %v972_v16, %s1858_s15 }
 0x456   : > { %v974_v17 = vpop.f32.mrf.mxu3 }
 0x457   : > { %v1739_v17 = vld [vmem:[%s758_s16] ss:$0 sm:$0xff] }
 0x4c1   : > { %v980_v19 = vpop.permute.xlu1 %979 }
 0x4c2   : > { %983 = vst.msk [vmem:[#allocation3] sm:$0x7f] %vm982_vm12, %v980_v19 }
 0x4c9   : > { %v984_v20 = vld [vmem:[#allocation3] sm:$0x7f] }
 0x4ca   : > { %v985_v21 = vpack.c.bf16 %v984_v20, %v984_v20 }
 0x4cc   : > { %1588 = vmatmul.msk.bf16.vlgmr.msrb.gmra.mxu0 %vm830_vm5, %v985_v21 }
 0x549   : > { %v1014_v23 = vpop.f32.mrf.mxu0 }
 0x54a   : > { %v1018_v24 = vadd.f32 %v1014_v23, %v2102_v1 }
 0x54c   : > { %v2159_v25 = vadd.f32 %v1735_v22, %v1018_v24 }
 0x54e   : > { %v1024_v26 = vsel %vm774_vm1, %v2159_v25, 0.0  ;;  %v1028_v27 = vmul.f32 %v2159_v25, %v2159_v25 }
 0x54f   : > { %1025 = vadd.xlane.f32.xlu2 %v1024_v26 }
 0x550   : > { %v1029_v28 = vsel %vm774_vm1, %v1028_v27, 0.0 }
 0x551   : > { %1030 = vadd.xlane.f32.xlu1 %v1029_v28  ;;  %v1016_v29 = vpop.f32.mrf.mxu0 }
 0x5c2   : > { %v1026_v32 = vpop.xlane.xlu2 %1025 }
 0x5c3   : > { %v1027_v1 = vmul.f32 0.03125, %v1026_v32 }
 0x5c4   : > { %v1031_v33 = vpop.xlane.xlu1 %1030 }
 0x5c5   : > { %v1034_v34 = vmul.f32 %v1027_v1, %v1027_v1  ;;  %v1032_v35 = vmul.f32 0.03125, %v1031_v33  ;;  %v1033_v45 = vsub.f32 %v2159_v25, %v1027_v1 }
 0x5c7   : > { %v1035_v37 = vsub.f32 %v1032_v35, %v1034_v34 }
 0x5c9   : > { %v1036_v38 = vadd.f32 1e-06, %v1035_v37 }
 0x5cb   : > { %1750 = vrsqrt.f32 %v1036_v38  ;;  %vm1043_vm14 = vweird.f32 %v1036_v38 }
 0x5d1   : > { %v1751_v39 = vpop.eup %1750 }
 0x5d2   : > { %v1038_v40 = vmul.f32 %v1751_v39, %v1036_v38  ;;  %vm1044_vm13 = vweird.f32 %v1751_v39 }
 0x5d3   : > { %vm1045_vm15 = vmor %vm1043_vm14, %vm1044_vm13 }
 0x5d4   : > { %v1039_v41 = vmul.f32 %v1751_v39, %v1038_v40 }
 0x5d6   : > { %v1040_v42 = vmul.f32 0.5, %v1039_v41 }
 0x5d8   : > { %v1041_v43 = vsub.f32 1.5, %v1040_v42 }
 0x5da   : > { %v1042_v44 = vmul.f32 %v1751_v39, %v1041_v43 }
 0x5dc   : > { %v1046_v47 = vsel %vm1045_vm15, %v1751_v39, %v1042_v44 }
 0x5dd   : > { %v1047_v48 = vmul.f32 %v1046_v47, %v1033_v45 }
 0x5df   : > { %v1052_v50 = vmul.f32 %v1736_v46, %v1047_v48 }
 0x5e1   : > { %v1057_v51 = vadd.f32 %v1737_v49, %v1052_v50 }
 0x5e3   : > { %v1058_v52 = vpack.c.bf16 %v1057_v51, %v1057_v51 }
 0x5e5   : > { %1597 = vmatmul.msk.bf16.vlgmr.msrb.gmra.mxu1 %vm830_vm5, %v1058_v52 }
 0x662   : > { %v1091_v63 = vpop.f32.mrf.mxu1 }
 0x663   : > { %v1092_v0 = vadd.f32 %v1738_v62, %v1091_v63 }
 0x665   : > { %v1095_v2 = vmul.f32 %v1092_v0, %v1092_v0 }
 0x667   : > { %v1096_v3 = vmul.f32 %v1095_v2, %v1092_v0 }
 0x669   : > { %v1097_v4 = vmul.f32 0.044715, %v1096_v3 }
 0x66a   : > { %v1093_v7 = vpop.f32.mrf.mxu1 }
 0x66b   : > { %v1098_v8 = vadd.f32 %v1097_v4, %v1092_v0 }
 0x66d   : > { %v1099_v11 = vmul.f32 0.7978846, %v1098_v8 }
 0x66f   : > { %1752 = vtanh.f32 %v1099_v11 }
 0x675   : > { %v1753_v12 = vpop.eup %1752 }
 0x676   : > { %v1101_v13 = vadd.f32 1.0, %v1753_v12 }
 0x678   : > { %v1102_v14 = vmul.f32 0.5, %v1101_v13 }
 0x67a   : > { %v1103_v15 = vmul.f32 %v1102_v14, %v1092_v0 }
 0x67c   : > { %v1104_v16 = vpack.c.bf16 %v1103_v15, %v1103_v15 }
 0x67e   : > { %1181 = vmatmul.bf16.vlgmr.msrb.gmra.mxu2 %v1104_v16 }
 0x701   : > { %v1182_v18 = vpop.f32.mrf.mxu2 }
 0x702   : > { %v1183_v19 = vadd.f32 %v1739_v17, %v1182_v18 }
 0x704   : > { %v2199_v20 = vadd.f32 %v1183_v19, %v2159_v25 }
 0x705   : > { %1191 = sbr.rel (%p1630_p1) target bundleno = 1944 (0x798), region = 88 }
 0x706   : > { %1187 = vst.msk [vmem:[#allocation2] sm:$0x7f] %vm774_vm1, %v2199_v20 }
 0x709   : > { %v1184_v21 = vpop.f32.mrf.mxu2 }
 0x70a   : > { %v1247_v22 = vrot.slane %v2199_v20, 1  ;;  %vm1249_vm0 = vcmask 259072   ;;  %v1193_v23 = vmul.f32 %v2139_v6, %v2136_v5  ;;  %vm1197_vm2 = vweird.f32 %v2136_v5  ;;  %v1272_v27 = vld [vmem:[%s2375_s19] sm:$0x1] }
 0x70b   : > { %v1203_v24 = vand.u32 2147483648, %v2136_v5  ;;  %v1208_v25 = vmul.f32 %v2146_v10, %v2143_v9  ;;  %vm1198_vm1 = vweird.f32 %v2139_v6  ;;  %v1201_v29 = vand.u32 2147483647, %v2136_v5 }
 0x70c   : > { %v1250_v26 = vsel %vm1249_vm0, %v1247_v22, 0.0  ;;  %1631 = vmatpush.xpose.msk.msra.mxu0 %vm830_vm5, %v1247_v22  ;;  %v1194_v28 = vsub.f32 1.0, %v1193_v23  ;;  %vm1212_vm3 = vweird.f32 %v2143_v9  ;;  %vm1213_vm4 = vweird.f32 %v2146_v10  ;;  %vm2225_vm6 = vmor %vm1197_vm2, %vm1198_vm1 }
 0x70d   : > { %v1251_v30 = vrot.slane %v1250_v26, 4  ;;  %v1209_v31 = vsub.f32 1.0, %v1208_v25  ;;  %v1216_v1 = vand.u32 2147483647, %v2143_v9  ;;  %v1218_v33 = vand.u32 2147483648, %v2143_v9  ;;  %vm1214_vm8 = vmor %vm1212_vm3, %vm1213_vm4 }
 0x70e   : > { %v1195_v32 = vmul.f32 %v2139_v6, %v1194_v28  ;;  %v1204_v36 = vor.u32 1.1754944e-38, %v1203_v24  ;;  %vm1202_vm7 = vcmp.eq.f32.partialorder %v1201_v29, 8.507059e+37  ;;  %v1859_v40 = vmov 2.0  }
 0x70f   : > { %v1252_v34 = vadd.f32 %v1251_v30, %v1250_v26  ;;  %1632 = vmatmul.msk.f32.vlgmr.msra.gmra.mxu0 %vm830_vm5, %v1272_v27  ;;  %v1210_v37 = vmul.f32 %v2146_v10, %v1209_v31  ;;  %v1219_v39 = vor.u32 1.1754944e-38, %v1218_v33  ;;  %1754 = vrcp.f32 %v1859_v40 }
 0x710   : > { %v1196_v38 = vadd.f32 %v2139_v6, %v1195_v32  ;;  %vm1217_vm9 = vcmp.eq.f32.partialorder %v1216_v1, 8.507059e+37  ;;  %v1860_v42 = vmov 6.0   ;;  %vm1225_vm10 = vcmask 1041409  }
 0x711   : > { %v1211_v9 = vadd.f32 %v2146_v10, %v1210_v37  ;;  %v1253_v41 = vrot.slane %v1252_v34, 2  ;;  %1756 = vrcp.f32 %v1860_v42  ;;  %vm1228_vm11 = vcmask 50176  }
 0x712   : > { %v1200_v5 = vsel %vm2225_vm6, %v2139_v6, %v1196_v38  ;;  %vm1244_vm14 = vcmask 49152   ;;  %v1274_v13 = vstv %s1273_s5  ;;  %vm1301_vm15 = vcmask 40960  }
 0x713   : > { %v1205_v43 = vsel %vm1202_vm7, %v1204_v36, %v1200_v5  ;;  %v1215_v44 = vsel %vm1214_vm8, %v2146_v10, %v1211_v9  ;;  %v1254_v49 = vadd.f32 %v1253_v41, %v1252_v34  ;;  %vm1270_vm0 = vcmask 516096  }
 0x714   : > { %v1220_v45 = vsel %vm1217_vm9, %v1219_v39, %v1215_v44  ;;  %v1206_v46 = vmul.f32 %v2128_v54, %v1205_v43 }
 0x715   : > { %v1221_v47 = vmul.f32 %v2132_v59, %v1220_v45  ;;  %v1755_v48 = vpop.eup %1754  ;;  %v1255_v57 = vrot.slane %v1254_v49, 1 }
 0x716   : > { %v1237_v51 = vmul.f32 2.0, %v1755_v48  ;;  %vm1241_vm13 = vweird.f32 %v1755_v48 }
 0x717   : > { %v1224_v50 = vrot.slane %v1221_v47, 7  ;;  %v1757_v52 = vpop.eup %1756  ;;  %v1256_v54 = vadd.f32 %v1255_v57, %v1254_v49 }
 0x718   : > { %v1238_v55 = vsub.f32 1.0, %v1237_v51  ;;  %v1258_v6 = vmul.f32 6.0, %v1757_v52  ;;  %vm1262_vm12 = vweird.f32 %v1757_v52 }
 0x719   : > { %v1226_v53 = vsel %vm1225_vm10, %v1224_v50, %v1206_v46 }
 0x71a   : > { %v1229_v56 = vsel %vm1228_vm11, %v1226_v53, 0.0  ;;  %v1259_v60 = vsub.f32 1.0, %v1258_v6  ;;  %v1239_v10 = vmul.f32 %v1755_v48, %v1238_v55 }
 0x71b   : > { %v1230_v58 = vrot.slane %v1229_v56, 4 }
 0x71c   : > { %v1260_v62 = vmul.f32 %v1757_v52, %v1259_v60  ;;  %v1240_v0 = vadd.f32 %v1755_v48, %v1239_v10 }
 0x71d   : > { %v1231_v61 = vadd.f32 %v1230_v58, %v1229_v56 }
 0x71e   : > { %v1261_v63 = vadd.f32 %v1757_v52, %v1260_v62  ;;  %v1242_v8 = vsel %vm1241_vm13, %v1755_v48, %v1240_v0 }
 0x71f   : > { %v1232_v59 = vrot.slane %v1231_v61, 2 }
 0x720   : > { %v1263_v3 = vsel %vm1262_vm12, %v1757_v52, %v1261_v63 }
 0x721   : > { %v1233_v2 = vadd.f32 %v1232_v59, %v1231_v61  ;;  %v1264_v4 = vmul.f32 %v1263_v3, %v1256_v54 }
 0x723   : > { %v1234_v7 = vrot.slane %v1233_v2, 1  ;;  %1266 = vrot.lane.b32.xlu0 %v1264_v4, %s1861_s13 }
 0x725   : > { %v1235_v11 = vadd.f32 %v1234_v7, %v1233_v2 }
 0x727   : > { %v1243_v12 = vmul.f32 %v1242_v8, %v1235_v11 }
 0x729   : > { %1245 = vst.msk [vmem:[%s2379_s17] sm:$0x1] %vm1244_vm14, %v1243_v12 }
 0x78c   : > { %v1297_v14 = vpop.f32.mrf.mxu0 }
 0x78d   : > { %v1298_v15 = vadd.f32 %v1297_v14, %v1274_v13 }
 0x78f   : > { %v1300_v16 = vmax.f32 %v1298_v15, 0.0 }
 0x791   : > { %1302 = vst.msk [vmem:[%s764_s3] sm:$0x1] %vm1301_vm15, %v1300_v16 }
 0x795   : > { %v1267_v17 = vpop.permute.xlu0 %1266 }
 0x796   : > { %v1269_v18 = vsel %vm830_vm5, %v2199_v20, %v1267_v17 }
 0x797   : > { %1271 = vst.msk [vmem:[%s2099_s21] sm:$0x1] %vm1270_vm0, %v1269_v18 }
 0x798 PF: > { %s2381_s29 = sld [smem:[#allocation11_spill]]  ;;  %s1320_s7 = sshll.u32 %s2099_s21, 4  ;;  %s1321_s7 = int_to_ptr.vmem [resolvable:$true] %s1320_s7 }
 0x799   : > { %s2382_s22 = sld [smem:[#allocation29_spill]]  ;;  %s2384_s20 = sand.u32 1, %s1828_s27  }
 0x79a   : > { %s1304_s3 = scalar_lea.sflag [#allocation6], %s2384_s20 }
 0x79f   : > { %s1318_s14 = scalar_lea.hbm %s2382_s22, %s2381_s29  ;;  %s1778_s19 = scalar_lea.hbm %s2382_s22, 2 }
 0x7a0   : > { %s1322_s28 = sshll.u32 %s1318_s14, 4  ;;  %s1323_s28 = int_to_ptr.hbm [resolvable:$true] %s1322_s28 }
 0x7a1   : > { %s1772_s26 = sshra.s32 %s1323_s28, 4  ;;  %s1773_s26 = int_to_ptr.hbm [resolvable:$true] %s1772_s26 }
 0x7a2   : > { %s1774_s18 = scalar_lea.hbm %s1773_s26, 1  ;;  %p1779_p6 = scmp.lt.s32.totalorder %s1773_s26, %s2382_s22 }
 0x7a3   : > { %p1775_p2 = scmp.ne.s32.totalorder %s1773_s26, %s1774_s18  ;;  %p1780_p7 = scmp.lt.s32.totalorder %s1778_s19, %s1774_s18 }
 0x7a5   : > { %p1776_p4 = pnand %p1775_p2, %p2004_p3  ;;  %p1781_p8 = por %p1780_p7, %p1779_p6 }
 0x7a7   : > { %p1777_p5 = pneg %p1776_p4 }
 0x7a9   : > { %p1782_p10 = pnand %p1781_p8, %p1777_p5 }
 0x7ab   : > { %1785 = shalt.err (!%p1782_p10)
}
 0x7ac   : > { %1653 = dma.vmem_to_hbm [thread:$0]  (%p2004_p3), %s1321_s7, 16, %s1323_s28, %s1304_s3  }
 0x7ad PF: > { %s2385_s21 = sld [smem:[#allocation14_spill]] }
 0x7ae   : > { %s2386_s15 = sld [smem:[#allocation8_spill]] }
 0x7b3   : > { %p1659_p11 = scmp.ge.s32.totalorder %s2385_s21, 2 }
 0x7b4   : > { %s1340_s17 = sand.u32 1, %s2386_s15  }
 0x7b5   : > { %p1656_p12 = pnand %p1659_p11, %p2014_p9  ;;  %s1341_s5 = scalar_lea.sflag [#allocation6], %s1340_s17 }
 0x7b7   : > { %p1657_p13 = pneg %p1656_p12 }
 0x7b9   : > { %1819 = dma.done.wait (%p1657_p13), %s1341_s5, 16  }
 0x7ba   : > { %1821 = vsyncadd (%p1657_p13), %s1341_s5, 4294967280  ;;  %s32_s19 = sadd.s32 1, %s2385_s21   ;;  %s2388_s24 = sld [smem:[#allocation9_spill]] }
 0x7bb   : > { %p29_p0 = scmp.ge.s32.totalorder %s32_s19, 6   ;;  %s2389_s28 = sld [smem:[#allocation19_spill]] }
 0x7bc   : > { %s2390_s29 = sld [smem:[#allocation12_spill]]  ;;  %s2394_s26 = smov %s1828_s27 }
 0x7bd   : > { %s2391_s0 = sld [smem:[#allocation13_spill]]  ;;  %31 = sbr.rel (!%p29_p0) target bundleno = 19 (0x13), region = 183 }
 0x7be   : > { %s2392_s30 = sld [smem:[#allocation15_spill]] }
 0x7bf   : > { %s2393_s18 = sld [smem:[#allocation17_spill]] }
 0x7c0   : > { %s2395_s27 = smov %s2388_s24 }
 0x7c2   :  { %1358 = vsyncpa [#allocation6], 1 }
 0x7c3   :  { %1360 = vsyncpa [#allocation6 + $0x1], 1 }

</bundles_post_ra>
